<compile_context>
chip_gen: v7x
topology: tpu7x:2x2x1
jax: 0.10.0
libtpu: 0.0.40
codegen_flags: <defaults>
</compile_context>

<pallas_src>
import functools
import inspect

import jax
import jax.numpy as jnp
from jax import lax
from jax.experimental import pallas as pl
from jax.experimental.pallas import tpu as pltpu


def _conv_bn_silu_kernel(k, xm_ref, *refs):
    """One grid step = one (image, row-strip, cout-tile) output block.

    xm_ref        : (T_H, Wp, Cin)      bf16 main rows of the halo strip
    refs[:k-1]    : (1,  Wp, Cin)       bf16 extra halo rows below the strip
    refs[k-1]     : (k, k, Cin, TC)     bf16 BN-scale-folded weight tile
    refs[k]       : (1, TC)             f32  BN shift (fused bias)
    refs[k+1]     : (T_H, W, TC)        bf16 output tile (lane-dense)
    refs[k+2]     : (T_H+k-1, Wp, Cin)  bf16 VMEM scratch (assembled strip)
    """
    tails = refs[:k - 1]
    w_ref, b_ref, o_ref, xs_ref = refs[k - 1], refs[k], refs[k + 1], refs[k + 2]

    t_h, _, cin = xm_ref.shape
    _, w_out, tc = o_ref.shape

    # Assemble the halo strip in VMEM (single strip copy; the per-tap windows
    # below are just small sublane-offset slices of this resident tile).
    xs_ref[pl.ds(0, t_h), :, :] = xm_ref[...]
    for r, tref in enumerate(tails):
        xs_ref[pl.ds(t_h + r, 1), :, :] = tref[...]

    # k*k per-tap MXU matmuls (contraction over Cin), f32 accumulation.
    acc = None
    for kh in range(k):
        for kw in range(k):
            patch = xs_ref[kh:kh + t_h, kw:kw + w_out, :].reshape(t_h * w_out, cin)
            part = jnp.dot(patch, w_ref[kh, kw], preferred_element_type=jnp.float32)
            acc = part if acc is None else acc + part

    # Folded BatchNorm shift (scale already in the weight) + SiLU, f32 math.
    y = acc + b_ref[...]
    y = y * jax.nn.sigmoid(y)              # logistic -> EUP slot
    o_ref[...] = y.reshape(t_h, w_out, tc).astype(o_ref.dtype)   # bf16 store


def _pick_row_tile(h, w, n):
    """Row-strip height T_H (a divisor of H).

    Target <=512 output positions per strip (bounds the f32 accumulator /
    epilogue vreg pressure — matters most on v5e's single vector-store slot)
    while keeping the parallel grid at >= 4 blocks so the DMA pipeline and the
    two v7x TensorCores stay busy.
    """
    divisors = [d for d in range(1, h + 1) if h % d == 0]
    cands = [d for d in divisors if d * w <= 512] or [1]
    good = [d for d in cands if (h // d) * n >= 4]
    return max(good) if good else max(cands)


try:
    _BS_HAS_PIPELINE_MODE = (
        hasattr(pl, "Buffered")
        and "pipeline_mode" in inspect.signature(pl.BlockSpec).parameters)
except (TypeError, ValueError):          # very old BlockSpec signature
    _BS_HAS_PIPELINE_MODE = False


def _spec(block_shape, index_map, *, single_buffer=False):
    """BlockSpec; operands whose block index never changes get ONE pipeline
    buffer (they are DMA'd once), halving their VMEM footprint."""
    if single_buffer and _BS_HAS_PIPELINE_MODE:
        return pl.BlockSpec(block_shape, index_map, pipeline_mode=pl.Buffered(1))
    return pl.BlockSpec(block_shape, index_map)


@functools.partial(jax.jit, static_argnames=("k", "pad"))
def conv_bn_silu(x_nchw, w_oihw, gamma, beta, running_mean, running_var,
                 *, k=3, pad=1, eps=1e-5):
    """Pallas-backed forward of Conv: act(bn(conv(x))).

    Stride=1, groups=1, dilation=1 (the configuration DynamicHead uses).
    # TODO(synk): stride>1 / groups>1 / dilation>1 variants of nn.Conv2d are
    # not covered by this kernel.
    """
    N, C1, H, W = x_nchw.shape
    C2 = w_oihw.shape[0]
    assert w_oihw.shape == (C2, C1, k, k)
    assert pad == k // 2, "kernel assumes 'same' autopad with stride 1"

    C2p = ((C2 + 127) // 128) * 128            # lane-dense padded Cout
    TC = C2p if C2p <= 512 else 256            # Cout tile: bounds weight VMEM (v7x)
    assert C2p % TC == 0
    n_cout = C2p // TC

    Hp, Wp = H + 2 * pad, W + 2 * pad
    t_h = _pick_row_tile(H, W, N)
    assert H % t_h == 0                        # picker returns a divisor; guard anyway
    n_strips = H // t_h
    n_halo = k - 1                             # extra rows below each strip

    # --- BN folding (eval mode) + weight prep (wrapper glue) ----------------
    scale = gamma / jnp.sqrt(running_var + eps)                   # (C2,)
    shift = beta - running_mean * scale                           # (C2,)
    w_hwio = jnp.transpose(w_oihw, (2, 3, 1, 0)) * scale          # (k,k,Cin,C2), scale folded
    w_p = jnp.zeros((k, k, C1, C2p), jnp.bfloat16).at[..., :C2].set(
        w_hwio.astype(jnp.bfloat16))
    shift_p = jnp.zeros((1, C2p), jnp.float32).at[0, :C2].set(
        shift.astype(jnp.float32))

    # --- activation layout: NCHW -> NHWC (bf16) -> spatial zero-pad ---------
    # One fused XLA pass; no im2col is ever written to HBM.
    x_nhwc = jnp.transpose(x_nchw, (0, 2, 3, 1)).astype(jnp.bfloat16)
    x_pad = jnp.pad(x_nhwc, ((0, 0), (pad, pad), (pad, pad), (0, 0)))   # (N,Hp,Wp,Cin)

    # --- BlockSpecs ----------------------------------------------------------
    # Main strip: padded rows [t*T_H, t*T_H + T_H).  Halo rows r=0..k-2 are the
    # padded rows (t+1)*T_H + r (1-row blocks, so block index == row index);
    # together they give the (T_H + k - 1)-row window needed for the strip.
    main_spec = pl.BlockSpec((None, t_h, Wp, C1), lambda n, t, c: (n, t, 0, 0))
    halo_specs = [
        pl.BlockSpec((None, 1, Wp, C1),
                     lambda n, t, c, _r=r, _th=t_h: (n, (t + 1) * _th + _r, 0, 0))
        for r in range(n_halo)
    ]
    w_spec = _spec((k, k, C1, TC), lambda n, t, c: (0, 0, 0, c),
                   single_buffer=(n_cout == 1))
    b_spec = _spec((1, TC), lambda n, t, c: (0, c), single_buffer=(n_cout == 1))
    out_spec = pl.BlockSpec((None, t_h, W, TC), lambda n, t, c: (n, t, 0, c))

    cost = pl.CostEstimate(
        flops=2 * N * H * W * k * k * C1 * C2,
        transcendentals=N * H * W * C2p,
        bytes_accessed=(x_pad.size * x_pad.dtype.itemsize
                        + w_p.size * w_p.dtype.itemsize
                        + shift_p.size * shift_p.dtype.itemsize
                        + N * H * W * C2p * 2),                  # bf16 output
    )

    out_p = pl.pallas_call(
        functools.partial(_conv_bn_silu_kernel, k),
        out_shape=jax.ShapeDtypeStruct((N, H, W, C2p), jnp.bfloat16),
        grid_spec=pltpu.PrefetchScalarGridSpec(
            num_scalar_prefetch=0,
            grid=(N, n_strips, n_cout),            # cout innermost: strip reused
            in_specs=[main_spec] + halo_specs + [w_spec, b_spec],
            out_specs=out_spec,
            scratch_shapes=[pltpu.VMEM((t_h + n_halo, Wp, C1), jnp.bfloat16)],
        ),
        compiler_params=pltpu.CompilerParams(
            dimension_semantics=("parallel", "parallel", "parallel"),
            vmem_limit_bytes=32 * 1024 * 1024,     # explicit; safe on v5e/v6e/v7x
        ),
        cost_estimate=cost,
    )(*([x_pad] * k + [w_p, shift_p]))

    # Un-pad Cout; back to NCHW to match the PyTorch module's contract.
    # (Consumers that accept NHWC could skip this transpose.)
    out_nhwc = out_p[..., :C2]
    return jnp.transpose(out_nhwc, (0, 3, 1, 2)).astype(x_nchw.dtype)


def reference(x_nchw, w_oihw, gamma, beta, running_mean, running_var,
              *, pad=1, eps=1e-5):
    """Pure-JAX f32 reference matching PyTorch Conv.forward (eval-mode BN)."""
    y = lax.conv_general_dilated(
        x_nchw, w_oihw, window_strides=(1, 1),
        padding=((pad, pad), (pad, pad)),
        dimension_numbers=("NCHW", "OIHW", "NCHW"))
    y = (y - running_mean[None, :, None, None]) / jnp.sqrt(
        running_var[None, :, None, None] + eps)
    y = y * gamma[None, :, None, None] + beta[None, :, None, None]
    return y * jax.nn.sigmoid(y)


if __name__ == "__main__":
    # Conv(c1=4, c2=8, k=3) on a (2, 4, 16, 16) input.
    N, C1, C2, H, W, K = 2, 4, 8, 16, 16, 3

    key = jax.random.PRNGKey(0)
    kx, kw, kg, kb, km, kv = jax.random.split(key, 6)

    x = jax.random.normal(kx, (N, C1, H, W), dtype=jnp.float32)
    # Conv2d weight (bias=False): shape (c2, c1, k, k)
    w = jax.random.normal(kw, (C2, C1, K, K), dtype=jnp.float32) * 0.1
    # BatchNorm2d parameters (eval-mode running stats, non-trivial)
    gamma = 1.0 + 0.1 * jax.random.normal(kg, (C2,), dtype=jnp.float32)
    beta = 0.1 * jax.random.normal(kb, (C2,), dtype=jnp.float32)
    running_mean = 0.1 * jax.random.normal(km, (C2,), dtype=jnp.float32)
    running_var = 1.0 + 0.1 * jax.random.uniform(kv, (C2,), dtype=jnp.float32)

    out = conv_bn_silu(x, w, gamma, beta, running_mean, running_var, k=K, pad=K // 2)
    out = jax.block_until_ready(out)

    ref = reference(x, w, gamma, beta, running_mean, running_var, pad=K // 2)
    assert out.shape == (N, C2, H, W), out.shape
    # Tolerance relaxed vs. pure-f32: activations/weights hit the MXU in bf16
    # and the kernel output is stored in bf16 (f32 accumulation + f32 epilogue).
    err = float(jnp.abs(out - ref).max())
    assert jnp.allclose(out, ref, atol=4e-2, rtol=4e-2), err

    print("KERNEL_OK")
</pallas_src>

<mosaic_0001>
module attributes {stable_mosaic.version = 11 : i64} {
  func.func @_conv_bn_silu_kernel(%arg0: i32, %arg1: i32, %arg2: i32, %arg3: memref<1x8x18x4xbf16, #tpu.memory_space<vmem>>, %arg4: memref<1x1x18x4xbf16, #tpu.memory_space<vmem>>, %arg5: memref<1x1x18x4xbf16, #tpu.memory_space<vmem>>, %arg6: memref<3x3x4x128xbf16, #tpu.memory_space<vmem>>, %arg7: memref<1x128xf32, #tpu.memory_space<vmem>>, %arg8: memref<1x8x16x128xbf16, #tpu.memory_space<vmem>>, %arg9: memref<10x18x4xbf16, #tpu.memory_space<vmem>>) attributes {dimension_semantics = [#tpu.dimension_semantics<parallel>, #tpu.dimension_semantics<parallel>, #tpu.dimension_semantics<parallel>], iteration_bounds = array<i64: 2, 2, 1>, scalar_prefetch = 0 : i64, scratch_operands = 1 : i64, tpu.core_type = #tpu.core_type<tc>, window_params = [{transform_indices = @transform_0, window_bounds = array<i64: 1, 8, 18, 4>}, {transform_indices = @transform_1, window_bounds = array<i64: 1, 1, 18, 4>}, {transform_indices = @transform_2, window_bounds = array<i64: 1, 1, 18, 4>}, {pipeline_mode = #tpu.pipeline_mode<synchronous>, transform_indices = @transform_3, window_bounds = array<i64: 3, 3, 4, 128>}, {pipeline_mode = #tpu.pipeline_mode<synchronous>, transform_indices = @transform_4, window_bounds = array<i64: 1, 128>}, {transform_indices = @transform_5, window_bounds = array<i64: 1, 8, 16, 128>}]} {
    %c0 = arith.constant 0 : index
    %c0_0 = arith.constant 0 : index
    %c0_1 = arith.constant 0 : index
    %c0_2 = arith.constant 0 : index
    %0 = vector.load %arg3[%c0, %c0_0, %c0_1, %c0_2] : memref<1x8x18x4xbf16, #tpu.memory_space<vmem>>, vector<1x8x18x4xbf16>
    %1 = vector.shape_cast %0 : vector<1x8x18x4xbf16> to vector<8x18x4xbf16>
    %c0_3 = arith.constant 0 : index
    %c0_4 = arith.constant 0 : index
    %c0_5 = arith.constant 0 : index
    %2 = vector.load %arg9[%c0_3, %c0_4, %c0_5] : memref<10x18x4xbf16, #tpu.memory_space<vmem>>, vector<8x18x4xbf16>
    tpu.vector_store %arg9[%c0_3, %c0_4, %c0_5], %1 {strides = array<i32>} : memref<10x18x4xbf16, #tpu.memory_space<vmem>>, vector<8x18x4xbf16>,
    %c0_6 = arith.constant 0 : index
    %c0_7 = arith.constant 0 : index
    %c0_8 = arith.constant 0 : index
    %c0_9 = arith.constant 0 : index
    %3 = vector.load %arg4[%c0_6, %c0_7, %c0_8, %c0_9] : memref<1x1x18x4xbf16, #tpu.memory_space<vmem>>, vector<1x1x18x4xbf16>
    %4 = vector.shape_cast %3 : vector<1x1x18x4xbf16> to vector<1x18x4xbf16>
    %c8 = arith.constant 8 : index
    %c0_10 = arith.constant 0 : index
    %c0_11 = arith.constant 0 : index
    %5 = vector.load %arg9[%c8, %c0_10, %c0_11] : memref<10x18x4xbf16, #tpu.memory_space<vmem>>, vector<1x18x4xbf16>
    tpu.vector_store %arg9[%c8, %c0_10, %c0_11], %4 {strides = array<i32>} : memref<10x18x4xbf16, #tpu.memory_space<vmem>>, vector<1x18x4xbf16>,
    %c0_12 = arith.constant 0 : index
    %c0_13 = arith.constant 0 : index
    %c0_14 = arith.constant 0 : index
    %c0_15 = arith.constant 0 : index
    %6 = vector.load %arg5[%c0_12, %c0_13, %c0_14, %c0_15] : memref<1x1x18x4xbf16, #tpu.memory_space<vmem>>, vector<1x1x18x4xbf16>
    %7 = vector.shape_cast %6 : vector<1x1x18x4xbf16> to vector<1x18x4xbf16>
    %c9 = arith.constant 9 : index
    %c0_16 = arith.constant 0 : index
    %c0_17 = arith.constant 0 : index
    %8 = vector.load %arg9[%c9, %c0_16, %c0_17] : memref<10x18x4xbf16, #tpu.memory_space<vmem>>, vector<1x18x4xbf16>
    tpu.vector_store %arg9[%c9, %c0_16, %c0_17], %7 {strides = array<i32>} : memref<10x18x4xbf16, #tpu.memory_space<vmem>>, vector<1x18x4xbf16>,
    %c0_18 = arith.constant 0 : index
    %c0_19 = arith.constant 0 : index
    %c0_20 = arith.constant 0 : index
    %9 = vector.load %arg9[%c0_18, %c0_19, %c0_20] : memref<10x18x4xbf16, #tpu.memory_space<vmem>>, vector<8x16x4xbf16>
    %10 = vector.shape_cast %9 : vector<8x16x4xbf16> to vector<128x4xbf16>
    %c0_21 = arith.constant 0 : index
    %c0_22 = arith.constant 0 : index
    %c0_23 = arith.constant 0 : index
    %c0_24 = arith.constant 0 : index
    %11 = vector.load %arg6[%c0_21, %c0_22, %c0_23, %c0_24] : memref<3x3x4x128xbf16, #tpu.memory_space<vmem>>, vector<1x1x4x128xbf16>
    %12 = vector.shape_cast %11 : vector<1x1x4x128xbf16> to vector<4x128xbf16>
    %cst = arith.constant dense<0.000000e+00> : vector<128x128xf32>
    %13 = tpu.matmul %10, %12, %cst {dimension_numbers = #tpu.dot_dimension_numbers<[1], [0], [0], [1], [0, 0, 1, 1], [], []>} : vector<128x4xbf16>, vector<4x128xbf16>, vector<128x128xf32> -> vector<128x128xf32>
    %c0_25 = arith.constant 0 : index
    %c1 = arith.constant 1 : index
    %c0_26 = arith.constant 0 : index
    %14 = vector.load %arg9[%c0_25, %c1, %c0_26] : memref<10x18x4xbf16, #tpu.memory_space<vmem>>, vector<8x16x4xbf16>
    %15 = vector.shape_cast %14 : vector<8x16x4xbf16> to vector<128x4xbf16>
    %c0_27 = arith.constant 0 : index
    %c1_28 = arith.constant 1 : index
    %c0_29 = arith.constant 0 : index
    %c0_30 = arith.constant 0 : index
    %16 = vector.load %arg6[%c0_27, %c1_28, %c0_29, %c0_30] : memref<3x3x4x128xbf16, #tpu.memory_space<vmem>>, vector<1x1x4x128xbf16>
    %17 = vector.shape_cast %16 : vector<1x1x4x128xbf16> to vector<4x128xbf16>
    %cst_31 = arith.constant dense<0.000000e+00> : vector<128x128xf32>
    %18 = tpu.matmul %15, %17, %cst_31 {dimension_numbers = #tpu.dot_dimension_numbers<[1], [0], [0], [1], [0, 0, 1, 1], [], []>} : vector<128x4xbf16>, vector<4x128xbf16>, vector<128x128xf32> -> vector<128x128xf32>
    %19 = arith.addf %13, %18 : vector<128x128xf32>
    %c0_32 = arith.constant 0 : index
    %c2 = arith.constant 2 : index
    %c0_33 = arith.constant 0 : index
    %20 = vector.load %arg9[%c0_32, %c2, %c0_33] : memref<10x18x4xbf16, #tpu.memory_space<vmem>>, vector<8x16x4xbf16>
    %21 = vector.shape_cast %20 : vector<8x16x4xbf16> to vector<128x4xbf16>
    %c0_34 = arith.constant 0 : index
    %c2_35 = arith.constant 2 : index
    %c0_36 = arith.constant 0 : index
    %c0_37 = arith.constant 0 : index
    %22 = vector.load %arg6[%c0_34, %c2_35, %c0_36, %c0_37] : memref<3x3x4x128xbf16, #tpu.memory_space<vmem>>, vector<1x1x4x128xbf16>
    %23 = vector.shape_cast %22 : vector<1x1x4x128xbf16> to vector<4x128xbf16>
    %cst_38 = arith.constant dense<0.000000e+00> : vector<128x128xf32>
    %24 = tpu.matmul %21, %23, %cst_38 {dimension_numbers = #tpu.dot_dimension_numbers<[1], [0], [0], [1], [0, 0, 1, 1], [], []>} : vector<128x4xbf16>, vector<4x128xbf16>, vector<128x128xf32> -> vector<128x128xf32>
    %25 = arith.addf %19, %24 : vector<128x128xf32>
    %c1_39 = arith.constant 1 : index
    %c0_40 = arith.constant 0 : index
    %c0_41 = arith.constant 0 : index
    %26 = vector.load %arg9[%c1_39, %c0_40, %c0_41] : memref<10x18x4xbf16, #tpu.memory_space<vmem>>, vector<8x16x4xbf16>
    %27 = vector.shape_cast %26 : vector<8x16x4xbf16> to vector<128x4xbf16>
    %c1_42 = arith.constant 1 : index
    %c0_43 = arith.constant 0 : index
    %c0_44 = arith.constant 0 : index
    %c0_45 = arith.constant 0 : index
    %28 = vector.load %arg6[%c1_42, %c0_43, %c0_44, %c0_45] : memref<3x3x4x128xbf16, #tpu.memory_space<vmem>>, vector<1x1x4x128xbf16>
    %29 = vector.shape_cast %28 : vector<1x1x4x128xbf16> to vector<4x128xbf16>
    %cst_46 = arith.constant dense<0.000000e+00> : vector<128x128xf32>
    %30 = tpu.matmul %27, %29, %cst_46 {dimension_numbers = #tpu.dot_dimension_numbers<[1], [0], [0], [1], [0, 0, 1, 1], [], []>} : vector<128x4xbf16>, vector<4x128xbf16>, vector<128x128xf32> -> vector<128x128xf32>
    %31 = arith.addf %25, %30 : vector<128x128xf32>
    %c1_47 = arith.constant 1 : index
    %c1_48 = arith.constant 1 : index
    %c0_49 = arith.constant 0 : index
    %32 = vector.load %arg9[%c1_47, %c1_48, %c0_49] : memref<10x18x4xbf16, #tpu.memory_space<vmem>>, vector<8x16x4xbf16>
    %33 = vector.shape_cast %32 : vector<8x16x4xbf16> to vector<128x4xbf16>
    %c1_50 = arith.constant 1 : index
    %c1_51 = arith.constant 1 : index
    %c0_52 = arith.constant 0 : index
    %c0_53 = arith.constant 0 : index
    %34 = vector.load %arg6[%c1_50, %c1_51, %c0_52, %c0_53] : memref<3x3x4x128xbf16, #tpu.memory_space<vmem>>, vector<1x1x4x128xbf16>
    %35 = vector.shape_cast %34 : vector<1x1x4x128xbf16> to vector<4x128xbf16>
    %cst_54 = arith.constant dense<0.000000e+00> : vector<128x128xf32>
    %36 = tpu.matmul %33, %35, %cst_54 {dimension_numbers = #tpu.dot_dimension_numbers<[1], [0], [0], [1], [0, 0, 1, 1], [], []>} : vector<128x4xbf16>, vector<4x128xbf16>, vector<128x128xf32> -> vector<128x128xf32>
    %37 = arith.addf %31, %36 : vector<128x128xf32>
    %c1_55 = arith.constant 1 : index
    %c2_56 = arith.constant 2 : index
    %c0_57 = arith.constant 0 : index
    %38 = vector.load %arg9[%c1_55, %c2_56, %c0_57] : memref<10x18x4xbf16, #tpu.memory_space<vmem>>, vector<8x16x4xbf16>
    %39 = vector.shape_cast %38 : vector<8x16x4xbf16> to vector<128x4xbf16>
    %c1_58 = arith.constant 1 : index
    %c2_59 = arith.constant 2 : index
    %c0_60 = arith.constant 0 : index
    %c0_61 = arith.constant 0 : index
    %40 = vector.load %arg6[%c1_58, %c2_59, %c0_60, %c0_61] : memref<3x3x4x128xbf16, #tpu.memory_space<vmem>>, vector<1x1x4x128xbf16>
    %41 = vector.shape_cast %40 : vector<1x1x4x128xbf16> to vector<4x128xbf16>
    %cst_62 = arith.constant dense<0.000000e+00> : vector<128x128xf32>
    %42 = tpu.matmul %39, %41, %cst_62 {dimension_numbers = #tpu.dot_dimension_numbers<[1], [0], [0], [1], [0, 0, 1, 1], [], []>} : vector<128x4xbf16>, vector<4x128xbf16>, vector<128x128xf32> -> vector<128x128xf32>
    %43 = arith.addf %37, %42 : vector<128x128xf32>
    %c2_63 = arith.constant 2 : index
    %c0_64 = arith.constant 0 : index
    %c0_65 = arith.constant 0 : index
    %44 = vector.load %arg9[%c2_63, %c0_64, %c0_65] : memref<10x18x4xbf16, #tpu.memory_space<vmem>>, vector<8x16x4xbf16>
    %45 = vector.shape_cast %44 : vector<8x16x4xbf16> to vector<128x4xbf16>
    %c2_66 = arith.constant 2 : index
    %c0_67 = arith.constant 0 : index
    %c0_68 = arith.constant 0 : index
    %c0_69 = arith.constant 0 : index
    %46 = vector.load %arg6[%c2_66, %c0_67, %c0_68, %c0_69] : memref<3x3x4x128xbf16, #tpu.memory_space<vmem>>, vector<1x1x4x128xbf16>
    %47 = vector.shape_cast %46 : vector<1x1x4x128xbf16> to vector<4x128xbf16>
    %cst_70 = arith.constant dense<0.000000e+00> : vector<128x128xf32>
    %48 = tpu.matmul %45, %47, %cst_70 {dimension_numbers = #tpu.dot_dimension_numbers<[1], [0], [0], [1], [0, 0, 1, 1], [], []>} : vector<128x4xbf16>, vector<4x128xbf16>, vector<128x128xf32> -> vector<128x128xf32>
    %49 = arith.addf %43, %48 : vector<128x128xf32>
    %c2_71 = arith.constant 2 : index
    %c1_72 = arith.constant 1 : index
    %c0_73 = arith.constant 0 : index
    %50 = vector.load %arg9[%c2_71, %c1_72, %c0_73] : memref<10x18x4xbf16, #tpu.memory_space<vmem>>, vector<8x16x4xbf16>
    %51 = vector.shape_cast %50 : vector<8x16x4xbf16> to vector<128x4xbf16>
    %c2_74 = arith.constant 2 : index
    %c1_75 = arith.constant 1 : index
    %c0_76 = arith.constant 0 : index
    %c0_77 = arith.constant 0 : index
    %52 = vector.load %arg6[%c2_74, %c1_75, %c0_76, %c0_77] : memref<3x3x4x128xbf16, #tpu.memory_space<vmem>>, vector<1x1x4x128xbf16>
    %53 = vector.shape_cast %52 : vector<1x1x4x128xbf16> to vector<4x128xbf16>
    %cst_78 = arith.constant dense<0.000000e+00> : vector<128x128xf32>
    %54 = tpu.matmul %51, %53, %cst_78 {dimension_numbers = #tpu.dot_dimension_numbers<[1], [0], [0], [1], [0, 0, 1, 1], [], []>} : vector<128x4xbf16>, vector<4x128xbf16>, vector<128x128xf32> -> vector<128x128xf32>
    %55 = arith.addf %49, %54 : vector<128x128xf32>
    %c2_79 = arith.constant 2 : index
    %c2_80 = arith.constant 2 : index
    %c0_81 = arith.constant 0 : index
    %56 = vector.load %arg9[%c2_79, %c2_80, %c0_81] : memref<10x18x4xbf16, #tpu.memory_space<vmem>>, vector<8x16x4xbf16>
    %57 = vector.shape_cast %56 : vector<8x16x4xbf16> to vector<128x4xbf16>
    %c2_82 = arith.constant 2 : index
    %c2_83 = arith.constant 2 : index
    %c0_84 = arith.constant 0 : index
    %c0_85 = arith.constant 0 : index
    %58 = vector.load %arg6[%c2_82, %c2_83, %c0_84, %c0_85] : memref<3x3x4x128xbf16, #tpu.memory_space<vmem>>, vector<1x1x4x128xbf16>
    %59 = vector.shape_cast %58 : vector<1x1x4x128xbf16> to vector<4x128xbf16>
    %cst_86 = arith.constant dense<0.000000e+00> : vector<128x128xf32>
    %60 = tpu.matmul %57, %59, %cst_86 {dimension_numbers = #tpu.dot_dimension_numbers<[1], [0], [0], [1], [0, 0, 1, 1], [], []>} : vector<128x4xbf16>, vector<4x128xbf16>, vector<128x128xf32> -> vector<128x128xf32>
    %61 = arith.addf %55, %60 : vector<128x128xf32>
    %c0_87 = arith.constant 0 : index
    %c0_88 = arith.constant 0 : index
    %62 = vector.load %arg7[%c0_87, %c0_88] : memref<1x128xf32, #tpu.memory_space<vmem>>, vector<1x128xf32>
    %63 = vector.broadcast %62 : vector<1x128xf32> to vector<128x128xf32>
    %64 = arith.addf %61, %63 : vector<128x128xf32>
    %65 = arith.negf %64 : vector<128x128xf32>
    %66 = math.exp %65 : vector<128x128xf32>
    %cst_89 = arith.constant 1.000000e+00 : f32
    %67 = vector.broadcast %cst_89 : f32 to vector<128x128xf32>
    %68 = arith.addf %67, %66 : vector<128x128xf32>
    %69 = arith.divf %67, %68 : vector<128x128xf32>
    %70 = arith.mulf %64, %69 : vector<128x128xf32>
    %71 = vector.shape_cast %70 : vector<128x128xf32> to vector<8x16x128xf32>
    %72 = arith.truncf %71 : vector<8x16x128xf32> to vector<8x16x128xbf16>
    %c0_90 = arith.constant 0 : index
    %c0_91 = arith.constant 0 : index
    %c0_92 = arith.constant 0 : index
    %c0_93 = arith.constant 0 : index
    %73 = vector.load %arg8[%c0_90, %c0_91, %c0_92, %c0_93] : memref<1x8x16x128xbf16, #tpu.memory_space<vmem>>, vector<1x8x16x128xbf16>
    %74 = vector.shape_cast %73 : vector<1x8x16x128xbf16> to vector<8x16x128xbf16>
    %75 = vector.shape_cast %72 : vector<8x16x128xbf16> to vector<1x8x16x128xbf16>
    tpu.vector_store %arg8[%c0_90, %c0_91, %c0_92, %c0_93], %75 {strides = array<i32>} : memref<1x8x16x128xbf16, #tpu.memory_space<vmem>>, vector<1x8x16x128xbf16>,
    return
  }
  func.func @transform_0(%arg0: i32, %arg1: i32, %arg2: i32) -> (i32, i32, i32, i32) {
    %c0_i32 = arith.constant 0 : i32
    %c0_i32_0 = arith.constant 0 : i32
    %c0_i32_1 = arith.constant 0 : i32
    return %arg0, %arg1, %c0_i32, %c0_i32_0 : i32, i32, i32, i32
  }
  func.func @transform_1(%arg0: i32, %arg1: i32, %arg2: i32) -> (i32, i32, i32, i32) {
    %c1_i32 = arith.constant 1 : i32
    %0 = arith.addi %arg1, %c1_i32 : i32
    %c8_i32 = arith.constant 8 : i32
    %1 = arith.muli %0, %c8_i32 : i32
    %c0_i32 = arith.constant 0 : i32
    %2 = arith.addi %1, %c0_i32 : i32
    %c0_i32_0 = arith.constant 0 : i32
    %c0_i32_1 = arith.constant 0 : i32
    %c0_i32_2 = arith.constant 0 : i32
    return %arg0, %2, %c0_i32_0, %c0_i32_1 : i32, i32, i32, i32
  }
  func.func @transform_2(%arg0: i32, %arg1: i32, %arg2: i32) -> (i32, i32, i32, i32) {
    %c1_i32 = arith.constant 1 : i32
    %0 = arith.addi %arg1, %c1_i32 : i32
    %c8_i32 = arith.constant 8 : i32
    %1 = arith.muli %0, %c8_i32 : i32
    %c1_i32_0 = arith.constant 1 : i32
    %2 = arith.addi %1, %c1_i32_0 : i32
    %c0_i32 = arith.constant 0 : i32
    %c0_i32_1 = arith.constant 0 : i32
    %c0_i32_2 = arith.constant 0 : i32
    return %arg0, %2, %c0_i32, %c0_i32_1 : i32, i32, i32, i32
  }
  func.func @transform_3(%arg0: i32, %arg1: i32, %arg2: i32) -> (i32, i32, i32, i32) {
    %c0_i32 = arith.constant 0 : i32
    %c0_i32_0 = arith.constant 0 : i32
    %c0_i32_1 = arith.constant 0 : i32
    %c0_i32_2 = arith.constant 0 : i32
    return %c0_i32, %c0_i32_0, %c0_i32_1, %arg2 : i32, i32, i32, i32
  }
  func.func @transform_4(%arg0: i32, %arg1: i32, %arg2: i32) -> (i32, i32) {
    %c0_i32 = arith.constant 0 : i32
    %c0_i32_0 = arith.constant 0 : i32
    return %c0_i32, %arg2 : i32, i32
  }
  func.func @transform_5(%arg0: i32, %arg1: i32, %arg2: i32) -> (i32, i32, i32, i32) {
    %c0_i32 = arith.constant 0 : i32
    %c0_i32_0 = arith.constant 0 : i32
    return %arg0, %arg1, %c0_i32, %arg2 : i32, i32, i32, i32
  }
}

</mosaic_0001>

<bundles_post_ra>
// kernel: conv_bn_silu.1
= control target key start
LH: loop header
LB: loop body
LE: loop exit
PB: predicated region body
PF: predicated region fallthrough
CT: control target
= control target key end

     0   :  { %s4244_s18 = smov 0   ;;  %s4246_s19 = smov 0   ;;  %s5260_s0 = inlined_call_operand.vmem [shape: bf16[2,18,18,4], index: 0, kind: input, shape index: {}, may-alias: {0,1,2}]   ;;  %s5261_s1 = inlined_call_operand.vmem [shape: bf16[2,18,18,4], index: 1, kind: input, shape index: {}, may-alias: {0,1,2}]   ;;  %s5262_s2 = inlined_call_operand.vmem [shape: bf16[2,18,18,4], index: 2, kind: input, shape index: {}, may-alias: {0,1,2}]   ;;  %s5263_s3 = inlined_call_operand.vmem [shape: bf16[3,3,4,128], index: 3, kind: input, shape index: {}]   ;;  %s5264_s4 = inlined_call_operand.vmem [shape: f32[1,128], index: 4, kind: input, shape index: {}]   ;;  %s5265_s5 = inlined_call_operand.vmem [shape: bf16[2,16,16,128], index: 5, kind: output, shape index: {}]  }
   0x1   :  { %s4248_s20 = smov 0   ;;  %s4250_s21 = smov 0  }
   0x2   :  { %s4252_s22 = smov 0  }
   0x3 LB: > { %s30_s23 = sadd.s32 1, %s4204_s20  ;;  %s34_s24 = sadd.s32 1, %s4208_s21  ;;  %s4212_s22 = sphi %s4252_s22, %s15_s22   ;;  %s4208_s21 = sphi %s4250_s21, %s5287_s21   ;;  %s4204_s20 = sphi %s4248_s20, %s5286_s20   ;;  %s4200_s19 = sphi %s4246_s19, %s5285_s19   ;;  %s4196_s18 = sphi %s4244_s18, %s5284_s18  }
   0x4   : > { %p32_p0 = scmp.ge.s32.totalorder %s30_s23, 2  ;;  %p3369_p1 = scmp.ge.s32.totalorder %s4212_s22, 1 }
   0x5   : > { %p297_p2 = scmp.lt.s32.totalorder %s4212_s22, 5 }
   0x6   : > { %s5289_s23 = smov (%p32_p0, %s30_s23), 0  ;;  %s5291_s24 = smov (!%p32_p0, %s34_s24), %s4208_s21 }
   0x7   : > { %p298_p3 = pnand %p3369_p1, %p297_p2  ;;  %p36_p4 = scmp.ge.s32.totalorder %s5291_s24, 2 }
   0x9   : > { %s5293_s24 = smov (%p36_p4, %s5291_s24), 0  ;;  %301 = sbr.rel (%p298_p3) target bundleno = 470 (0x1d6), region = 40 }
  0x10   : > { %v3380_v0 = vld [vmem:[%s5263_s3 + $0x2] sm:$0x3]  ;;  %vm779_vm0 = vcmask 1041408   ;;  %v3455_v1 = vld [vmem:[%s5263_s3 + $0x8] sm:$0x3]  ;;  %s4280_s29 = sshll.u32 %s4196_s18, 3 }
  0x11   : > { %4039 = vmatprep.subr.msk.bf16.mxu1 %vm779_vm0, %v3380_v0  ;;  %4043 = vmatprep.subr.msk.bf16.mxu0 %vm779_vm0, %v3455_v1  ;;  %v781_v2 = vsel %vm779_vm0, %v3380_v0, 0  ;;  %v4286_v3 = vsel %vm779_vm0, %v3455_v1, 0  ;;  %p379_p5 = scmp.lt.s32.totalorder %s4200_s19, 1  ;;  %p381_p6 = scmp.lt.s32.totalorder %s4280_s29, 17  ;;  %v4295_v4 = vld [vmem:[%s5263_s3] sm:$0x3] }
  0x12   : > { %3748 = vmatpush3.bf16.msra.mxu1 %v781_v2  ;;  %3820 = vmatpush3.bf16.msra.mxu0 %v4286_v3  ;;  %v4300_v5 = vld [vmem:[%s5263_s3 + $0xa] sm:$0x3]  ;;  %vm468_vm1 = vcmask 27648   ;;  %vm471_vm2 = vcmask 24576   ;;  %vm533_vm3 = vsmask.f32 3328 }
  0x13   : > { %s5295_s19 = smov (!%p379_p5, %s4200_s19), 1  ;;  %4040 = vmatprep.subr.msk.bf16.mxu1 %vm779_vm0, %v4295_v4  ;;  %4045 = vmatprep.subr.msk.bf16.mxu0 %vm779_vm0, %v4300_v5  ;;  %vm534_vm4 = vsmask.f32 7440  ;;  %vm754_vm5 = vcmask 31744   ;;  %v4381_v41 = vsel %vm779_vm0, %v4295_v4, 0  ;;  %v4403_v61 = vsel %vm779_vm0, %v4300_v5, 0 }
  0x14   : > { %s382_s9 = scalar_select %p381_p6, %s4280_s29, 17  ;;  %v4387_v50 = vld [vmem:[%s5263_s3 + $0xc] sm:$0x3]  ;;  %vm4395_vm6 = vmor %vm533_vm3, %vm534_vm4  ;;  %vm1068_vm7 = vcmask 1042432   ;;  %vm1069_vm8 = vcmask 1046532  }
  0x15   : > { %s4308_s10 = smul.u32 54, %s5295_s19  ;;  %v4407_v1 = vsel %vm779_vm0, %v4387_v50, 0  ;;  %s4432_s25 = sadd.s32 8, %s4280_s29  ;;  %vm4562_vm9 = vmor %vm1068_vm7, %vm1069_vm8  ;;  %v5139_v56 = vld [vmem:[%s5264_s4] ss:$0 sm:$0xff] }
  0x16   : > { %s4049_s11 = smul.u32 3, %s382_s9  ;;  %p398_p7 = scmp.lt.s32.totalorder %s4432_s25, 17 }
  0x17   : > { %s409_s7 = sadd.s32 1, %s4432_s25  ;;  %p432_p9 = scmp.lt.s32.totalorder %s4280_s29, 15 }
  0x18   : > { %s385_s12 = sadd.s32 %s4308_s10, %s4049_s11  ;;  %p4520_p8 = scmp.lt.s32.totalorder %s409_s7, 17 }
  0x19   : > { %s3371_s13 = sshll.u32 %s385_s12, 2  ;;  %s5299_s29 = smov (!%p432_p9, %s4280_s29), 15 }
  0x1a   : > { %s4314_s16 = scalar_lea.vmem %s5260_s0, %s3371_s13  ;;  %s5297_s7 = smov (!%p4520_p8, %s409_s7), 17 }
  0x1b   : > { %v444_v6 = vld [vmem:[%s4314_s16] sm:$0xf]  ;;  %v445_v7 = vld [vmem:[%s4314_s16 + $0x4] sm:$0xf]  ;;  %v446_v8 = vld [vmem:[%s4314_s16 + $0x8] sm:$0x1] }
  0x1c   : > { %469 = vst.msk [vmem:[#allocation2] sm:$0xf] %vm468_vm1, %v444_v6  ;;  %470 = vst.msk [vmem:[#allocation2 + $0x4] sm:$0xf] %vm468_vm1, %v445_v7  ;;  %v447_v9 = vld [vmem:[%s4314_s16 + $0xc] sm:$0xf] }
  0x1d   : > { %472 = vst.msk [vmem:[#allocation2 + $0x8] sm:$0x1] %vm471_vm2, %v446_v8  ;;  %v448_v10 = vld [vmem:[%s4314_s16 + $0x10] sm:$0xf]  ;;  %v449_v11 = vld [vmem:[%s4314_s16 + $0x14] sm:$0x1] }
  0x1e   : > { %473 = vst.msk [vmem:[#allocation2 + $0xc] sm:$0xf] %vm468_vm1, %v447_v9  ;;  %474 = vst.msk [vmem:[#allocation2 + $0x10] sm:$0xf] %vm468_vm1, %v448_v10  ;;  %v450_v12 = vld [vmem:[%s4314_s16 + $0x18] sm:$0xf] }
  0x1f   : > { %475 = vst.msk [vmem:[#allocation2 + $0x14] sm:$0x1] %vm471_vm2, %v449_v11  ;;  %v451_v13 = vld [vmem:[%s4314_s16 + $0x1c] sm:$0xf]  ;;  %v452_v14 = vld [vmem:[%s4314_s16 + $0x20] sm:$0x1] }
  0x20   : > { %476 = vst.msk [vmem:[#allocation2 + $0x18] sm:$0xf] %vm468_vm1, %v450_v12  ;;  %477 = vst.msk [vmem:[#allocation2 + $0x1c] sm:$0xf] %vm468_vm1, %v451_v13  ;;  %v453_v15 = vld [vmem:[%s4314_s16 + $0x24] sm:$0xf] }
  0x21   : > { %478 = vst.msk [vmem:[#allocation2 + $0x20] sm:$0x1] %vm471_vm2, %v452_v14  ;;  %v454_v16 = vld [vmem:[%s4314_s16 + $0x28] sm:$0xf]  ;;  %v455_v17 = vld [vmem:[%s4314_s16 + $0x2c] sm:$0x1] }
  0x22   : > { %479 = vst.msk [vmem:[#allocation2 + $0x24] sm:$0xf] %vm468_vm1, %v453_v15  ;;  %480 = vst.msk [vmem:[#allocation2 + $0x28] sm:$0xf] %vm468_vm1, %v454_v16  ;;  %v456_v18 = vld [vmem:[%s4314_s16 + $0x30] sm:$0xf] }
  0x23   : > { %481 = vst.msk [vmem:[#allocation2 + $0x2c] sm:$0x1] %vm471_vm2, %v455_v17  ;;  %v457_v19 = vld [vmem:[%s4314_s16 + $0x34] sm:$0xf]  ;;  %v458_v20 = vld [vmem:[%s4314_s16 + $0x38] sm:$0x1] }
  0x24   : > { %482 = vst.msk [vmem:[#allocation2 + $0x30] sm:$0xf] %vm468_vm1, %v456_v18  ;;  %483 = vst.msk [vmem:[#allocation2 + $0x34] sm:$0xf] %vm468_vm1, %v457_v19  ;;  %v459_v21 = vld [vmem:[%s4314_s16 + $0x3c] sm:$0xf] }
  0x25   : > { %484 = vst.msk [vmem:[#allocation2 + $0x38] sm:$0x1] %vm471_vm2, %v458_v20  ;;  %v460_v22 = vld [vmem:[%s4314_s16 + $0x40] sm:$0xf]  ;;  %v461_v23 = vld [vmem:[%s4314_s16 + $0x44] sm:$0x1] }
  0x26   : > { %485 = vst.msk [vmem:[#allocation2 + $0x3c] sm:$0xf] %vm468_vm1, %v459_v21  ;;  %486 = vst.msk [vmem:[#allocation2 + $0x40] sm:$0xf] %vm468_vm1, %v460_v22  ;;  %v462_v24 = vld [vmem:[%s4314_s16 + $0x48] sm:$0xf] }
  0x27   : > { %487 = vst.msk [vmem:[#allocation2 + $0x44] sm:$0x1] %vm471_vm2, %v461_v23  ;;  %v463_v25 = vld [vmem:[%s4314_s16 + $0x4c] sm:$0xf]  ;;  %v464_v26 = vld [vmem:[%s4314_s16 + $0x50] sm:$0x1] }
  0x28   : > { %488 = vst.msk [vmem:[#allocation2 + $0x48] sm:$0xf] %vm468_vm1, %v462_v24  ;;  %489 = vst.msk [vmem:[#allocation2 + $0x4c] sm:$0xf] %vm468_vm1, %v463_v25  ;;  %v465_v27 = vld [vmem:[%s4314_s16 + $0x54] sm:$0xf] }
  0x29   : > { %490 = vst.msk [vmem:[#allocation2 + $0x50] sm:$0x1] %vm471_vm2, %v464_v26  ;;  %v466_v28 = vld [vmem:[%s4314_s16 + $0x58] sm:$0xf]  ;;  %v467_v29 = vld [vmem:[%s4314_s16 + $0x5c] sm:$0x1] }
  0x2a   : > { %v4361_v30 = vld [vmem:[#allocation2] sm:$0xf]  ;;  %v4363_v31 = vld [vmem:[#allocation2 + $0x4] sm:$0xf]  ;;  %v4365_v32 = vld [vmem:[#allocation2 + $0x8] sm:$0x1] }
  0x2b   : > { %491 = vst.msk [vmem:[#allocation2 + $0x54] sm:$0xf] %vm468_vm1, %v465_v27  ;;  %492 = vst.msk [vmem:[#allocation2 + $0x58] sm:$0xf] %vm468_vm1, %v466_v28  ;;  %v537_v33 = vshrl.u32 %v4361_v30, 16  ;;  %v540_v34 = vshll.u32 %v4361_v30, 16 }
  0x2c   : > { %493 = vst.msk [vmem:[#allocation2 + $0x5c] sm:$0x1] %vm471_vm2, %v467_v29  ;;  %v546_v35 = vshll.u32 %v4363_v31, 16  ;;  %v550_v36 = vshrl.u32 %v4363_v31, 16  ;;  %v1492_v37 = vld [vmem:[#allocation2 + $0xc] sm:$0xf] }
  0x2d   : > { %v556_v38 = vshll.u32 %v4365_v32, 16  ;;  %v4375_v39 = vld [vmem:[#allocation2 + $0x10] sm:$0xf]  ;;  %v4377_v40 = vld [vmem:[#allocation2 + $0x14] sm:$0x1]  ;;  %v539_v42 = vrot.slane %v537_v33, 4 }
  0x2e   : > { %v542_v43 = vrot.slane %v540_v34, 5  ;;  %v548_v44 = vrot.slane %v546_v35, 5  ;;  %v552_v45 = vrot.slane %v550_v36, 4  ;;  %v1517_v47 = vshrl.u32 %v1492_v37, 16  ;;  %v4391_v55 = vld [vmem:[#allocation2 + $0xc] sm:$0xf] }
  0x2f   : > { %v558_v46 = vrot.slane %v556_v38, 5  ;;  %v1520_v48 = vshll.u32 %v1492_v37, 16  ;;  %v1526_v49 = vshll.u32 %v4375_v39, 16  ;;  %v1530_v53 = vshrl.u32 %v4375_v39, 16  ;;  %v4399_v60 = vld [vmem:[#allocation2 + $0x10] sm:$0xf] }
  0x30   : > { %v543_v51 = vor.u32 %v542_v43, %v539_v42  ;;  %v553_v52 = vor.u32 %v552_v45, %v548_v44  ;;  %v1536_v54 = vshll.u32 %v4377_v40, 16  ;;  %v1519_v57 = vrot.slane %v1517_v47, 4  ;;  %v4409_v6 = vld [vmem:[#allocation2 + $0x14] sm:$0x1]  ;;  %v1495_v16 = vld [vmem:[#allocation2 + $0x18] sm:$0xf] }
  0x31   : > { %v1522_v58 = vrot.slane %v1520_v48, 5  ;;  %v1528_v59 = vrot.slane %v1526_v49, 5  ;;  %v1532_v0 = vrot.slane %v1530_v53, 4  ;;  %v561_v7 = vshrl.u32 %v4391_v55, 16  ;;  %v4420_v21 = vld [vmem:[#allocation2 + $0x1c] sm:$0xf] }
  0x32   : > { %v544_v62 = vrot.slane %v543_v51, 4  ;;  %v554_v63 = vrot.slane %v553_v52, 4  ;;  %v1538_v4 = vrot.slane %v1536_v54, 5  ;;  %v564_v8 = vshll.u32 %v4391_v55, 16  ;;  %v4427_v26 = vld [vmem:[#allocation2 + $0x20] sm:$0x1] }
  0x33   : > { %v1523_v2 = vor.u32 %v1522_v58, %v1519_v57  ;;  %v1533_v10 = vor.u32 %v1532_v0, %v1528_v59  ;;  %v570_v11 = vshll.u32 %v4399_v60, 16  ;;  %v563_v14 = vrot.slane %v561_v7, 4  ;;  %v4437_v45 = vld [vmem:[#allocation2 + $0x18] sm:$0xf]  ;;  %v4443_v51 = vld [vmem:[#allocation2 + $0x1c] sm:$0xf] }
  0x34   : > { %v549_v9 = vsel %vm4395_vm6, %v544_v62, %v548_v44  ;;  %v559_v5 = vsel %vm4395_vm6, %v554_v63, %v558_v46  ;;  %v566_v15 = vrot.slane %v564_v8, 5  ;;  %v574_v19 = vshrl.u32 %v4399_v60, 16  ;;  %v4451_v62 = vld [vmem:[#allocation2 + $0x20] sm:$0x1]  ;;  %s4464_s26 = scalar_select %p398_p7, %s4432_s25, 17 }
  0x35   : > { %v3381_v12 = vcombine.low %v549_v9, %v559_v5  ;;  %v1524_v13 = vrot.slane %v1523_v2, 4  ;;  %v1534_v17 = vrot.slane %v1533_v10, 4  ;;  %v572_v18 = vrot.slane %v570_v11, 5  ;;  %v1498_v9 = vld [vmem:[#allocation2 + $0x24] sm:$0xf]  ;;  %s4052_s14 = smul.u32 3, %s5297_s7 }
  0x36   : > { %v580_v20 = vshll.u32 %v4409_v6, 16  ;;  %v1908_v23 = vrot.slane %v4375_v39, 5  ;;  %v1911_v24 = vrot.slane %v4377_v40, 5  ;;  %v567_v25 = vor.u32 %v566_v15, %v563_v14  ;;  %s4051_s30 = smul.u32 3, %s4464_s26  ;;  %s3377_s12 = sshll.u32 %s5299_s29, 1 }
  0x37   : > { %3749 = vmatprep.mubr.msk.bf16.mxu1 %vm754_vm5, %v3381_v12  ;;  %v1529_v22 = vsel %vm4395_vm6, %v1524_v13, %v1528_v59  ;;  %v1539_v27 = vsel %vm4395_vm6, %v1534_v17, %v1538_v4  ;;  %v576_v28 = vrot.slane %v574_v19, 4  ;;  %v1541_v33 = vshrl.u32 %v1495_v16, 16  ;;  %v4459_v13 = vld [vmem:[#allocation2 + $0x28] sm:$0xf]  ;;  %s4594_s15 = sadd.s32 %s4052_s14, %s4308_s10 }
  0x38   : > { %v582_v29 = vrot.slane %v580_v20, 5  ;;  %v3456_v34 = vcombine.low %v1529_v22, %v1539_v27  ;;  %v568_v35 = vrot.slane %v567_v25, 4  ;;  %v1544_v36 = vshll.u32 %v1495_v16, 16  ;;  %v4475_v22 = vld [vmem:[#allocation2 + $0x2c] sm:$0x1]  ;;  %s4506_s6 = sadd.s32 %s4051_s30, %s4308_s10  ;;  %s3375_s10 = sshll.u32 %s4594_s15, 2 }
  0x39   : > { %v1550_v37 = vshll.u32 %v4420_v21, 16  ;;  %v577_v38 = vor.u32 %v576_v28, %v572_v18  ;;  %v1543_v42 = vrot.slane %v1541_v33, 4  ;;  %v1554_v43 = vshrl.u32 %v4420_v21, 16  ;;  %s3373_s8 = sshll.u32 %s4506_s6, 2  ;;  %s418_s26 = scalar_lea.vmem %s5262_s2, %s3375_s10 }
  0x3a   : > { %v1560_v44 = vshll.u32 %v4427_v26, 16  ;;  %3821 = vmatprep.mubr.msk.bf16.mxu0 %vm754_vm5, %v3456_v34  ;;  %v573_v46 = vsel %vm4395_vm6, %v568_v35, %v572_v18  ;;  %v1546_v47 = vrot.slane %v1544_v36, 5  ;;  %v1915_v49 = vrot.slane %v4420_v21, 5  ;;  %v4470_v18 = vld [vmem:[%s5263_s3 + $0x4] sm:$0x3]  ;;  %s404_s13 = scalar_lea.vmem %s5261_s1, %s3373_s8 }
  0x3b   : > { %v1552_v48 = vrot.slane %v1550_v37, 5  ;;  %v578_v52 = vrot.slane %v577_v38, 4  ;;  %v1556_v53 = vrot.slane %v1554_v43, 4  ;;  %v1918_v57 = vrot.slane %v4427_v26, 5  ;;  %v4481_v35 = vld [vmem:[#allocation2 + $0x24] sm:$0xf] }
  0x3c   : > { %v1562_v54 = vrot.slane %v1560_v44, 5  ;;  %v1547_v58 = vor.u32 %v1546_v47, %v1543_v42  ;;  %v4449_v59 = vrot.slane %v1915_v49, 4  ;;  %v585_v63 = vshrl.u32 %v4437_v45, 16  ;;  %v4483_v43 = vld [vmem:[#allocation2 + $0x28] sm:$0xf] }
  0x3d   : > { %v588_v0 = vshll.u32 %v4437_v45, 16  ;;  %v583_v2 = vsel %vm4395_vm6, %v578_v52, %v582_v29  ;;  %v1557_v4 = vor.u32 %v1556_v53, %v1552_v48  ;;  %v594_v7 = vshll.u32 %v4443_v51, 16  ;;  %v4493_v53 = vld [vmem:[#allocation2 + $0x2c] sm:$0x1] }
  0x3e   : > { %v598_v8 = vshrl.u32 %v4443_v51, 16  ;;  %v3382_v5 = vcombine.low %v573_v46, %v583_v2  ;;  %v1548_v10 = vrot.slane %v1547_v58, 4  ;;  %v587_v11 = vrot.slane %v585_v63, 4 }
  0x3f   : > { %v590_v12 = vrot.slane %v588_v0, 5  ;;  %v1558_v14 = vrot.slane %v1557_v4, 4  ;;  %v596_v15 = vrot.slane %v594_v7, 5  ;;  %v604_v17 = vshll.u32 %v4451_v62, 16  ;;  %v1501_v7 = vld [vmem:[#allocation2 + $0x30] sm:$0xf] }
  0x40   : > { %v600_v16 = vrot.slane %v598_v8, 4  ;;  %3750 = vmatmul.mubr.msk.bf16.vlgmr.msra.gmra.mrb[0].mxu1 %vm754_vm5, %v3382_v5  ;;  %v1553_v19 = vsel %vm4395_vm6, %v1548_v10, %v1552_v48  ;;  %v1565_v25 = vshrl.u32 %v1498_v9, 16  ;;  %v1568_v27 = vshll.u32 %v1498_v9, 16 }
  0x41   : > { %v591_v20 = vor.u32 %v590_v12, %v587_v11  ;;  %3766 = vmatpush3.bf16.msra.mxu1 %v4381_v41  ;;  %v1563_v28 = vsel %vm4395_vm6, %v1558_v14, %v1562_v54  ;;  %v606_v33 = vrot.slane %v604_v17, 5  ;;  %v1574_v34 = vshll.u32 %v4459_v13, 16  ;;  %v4501_v11 = vld [vmem:[#allocation2 + $0x34] sm:$0xf] }
  0x42   : > { %v601_v29 = vor.u32 %v600_v16, %v596_v15  ;;  %v3457_v36 = vcombine.low %v1553_v19, %v1563_v28  ;;  %v1567_v38 = vrot.slane %v1565_v25, 4  ;;  %v1570_v42 = vrot.slane %v1568_v27, 5  ;;  %4041 = vmatprep.subr.msk.bf16.mxu1 %vm779_vm0, %v4470_v18  ;;  %v4514_v19 = vld [vmem:[#allocation2 + $0x38] sm:$0x1] }
  0x43   : > { %v592_v37 = vrot.slane %v591_v20, 4  ;;  %v1576_v44 = vrot.slane %v1574_v34, 5  ;;  %v1578_v46 = vshrl.u32 %v4459_v13, 16  ;;  %v1584_v47 = vshll.u32 %v4475_v22, 16 }
  0x44   : > { %v602_v41 = vrot.slane %v601_v29, 4  ;;  %3822 = vmatmul.mubr.msk.bf16.vlgmr.msra.gmra.mrb[0].mxu0 %vm754_vm5, %v3457_v36  ;;  %v1571_v52 = vor.u32 %v1570_v42, %v1567_v38  ;;  %v609_v54 = vshrl.u32 %v4481_v35, 16  ;;  %v612_v58 = vshll.u32 %v4481_v35, 16  ;;  %v4525_v38 = vld [vmem:[#allocation2 + $0x30] sm:$0xf] }
  0x45   : > { %v597_v48 = vsel %vm4395_vm6, %v592_v37, %v596_v15  ;;  %3838 = vmatpush3.bf16.msra.mxu0 %v4403_v61  ;;  %v1580_v0 = vrot.slane %v1578_v46, 4  ;;  %v1586_v2 = vrot.slane %v1584_v47, 5  ;;  %v618_v4 = vshll.u32 %v4483_v43, 16  ;;  %v4530_v47 = vld [vmem:[#allocation2 + $0x34] sm:$0xf] }
  0x46   : > { %v607_v63 = vsel %vm4395_vm6, %v602_v41, %v606_v33  ;;  %v1572_v9 = vrot.slane %v1571_v52, 4  ;;  %v611_v5 = vrot.slane %v609_v54, 4  ;;  %v614_v10 = vrot.slane %v612_v58, 5  ;;  %4046 = vmatprep.subr.msk.bf16.mxu0 %vm779_vm0, %v4387_v50 }
  0x47   : > { %v3383_v8 = vcombine.low %v597_v48, %v607_v63  ;;  %v1581_v61 = vor.u32 %v1580_v0, %v1576_v44  ;;  %v620_v12 = vrot.slane %v618_v4, 5  ;;  %v622_v14 = vshrl.u32 %v4483_v43, 16  ;;  %v4534_v63 = vld [vmem:[#allocation2 + $0x38] sm:$0x1]  ;;  %v1874_v0 = vld [vmem:[#allocation2 + $0xc] sm:$0xe] }
  0x48   : > { %v628_v15 = vshll.u32 %v4493_v53, 16  ;;  %v1577_v16 = vsel %vm4395_vm6, %v1572_v9, %v1576_v44  ;;  %v615_v17 = vor.u32 %v614_v10, %v611_v5  ;;  %v1589_v50 = vshrl.u32 %v1501_v7, 16  ;;  %v4541_v9 = vld [vmem:[#allocation2 + $0x3c] sm:$0xf] }
  0x49   : > { %3753 = vmatprep.mubr.msk.bf16.mxu1 %vm754_vm5, %v3383_v8  ;;  %v1592_v20 = vshll.u32 %v1501_v7, 16  ;;  %v1582_v25 = vrot.slane %v1581_v61, 4  ;;  %v624_v27 = vrot.slane %v622_v14, 4  ;;  %v1598_v29 = vshll.u32 %v4501_v11, 16  ;;  %v494_v14 = vld [vmem:[%s404_s13] sm:$0xf] }
  0x4a   : > { %v630_v28 = vrot.slane %v628_v15, 5  ;;  %v616_v33 = vrot.slane %v615_v17, 4  ;;  %v1591_v34 = vrot.slane %v1589_v50, 4  ;;  %v1602_v37 = vshrl.u32 %v4501_v11, 16  ;;  %498 = vst.msk [vmem:[#allocation2 + $0x60] sm:$0xf] %vm468_vm1, %v494_v14 }
  0x4b   : > { %v1594_v36 = vrot.slane %v1592_v20, 5  ;;  %v1587_v42 = vsel %vm4395_vm6, %v1582_v25, %v1586_v2  ;;  %v625_v41 = vor.u32 %v624_v27, %v620_v12  ;;  %v1600_v44 = vrot.slane %v1598_v29, 5  ;;  %v4555_v20 = vld [vmem:[#allocation2 + $0x40] sm:$0xf]  ;;  %v495_v25 = vld [vmem:[%s404_s13 + $0x4] sm:$0xf] }
  0x4c   : > { %v1608_v46 = vshll.u32 %v4514_v19, 16  ;;  %v3458_v48 = vcombine.low %v1577_v16, %v1587_v42  ;;  %v621_v52 = vsel %vm4395_vm6, %v616_v33, %v620_v12  ;;  %v1604_v58 = vrot.slane %v1602_v37, 4  ;;  %499 = vst.msk [vmem:[#allocation2 + $0x64] sm:$0xf] %vm468_vm1, %v495_v25  ;;  %v4597_v25 = vld [vmem:[#allocation2 + $0x4c] sm:$0xf] }
  0x4d   : > { %v1595_v54 = vor.u32 %v1594_v36, %v1591_v34  ;;  %v626_v2 = vrot.slane %v625_v41, 4  ;;  %v633_v7 = vshrl.u32 %v4525_v38, 16  ;;  %v636_v8 = vshll.u32 %v4525_v38, 16  ;;  %v496_v36 = vld [vmem:[%s404_s13 + $0x8] sm:$0x1]  ;;  %s3378_s13 = sshll.u32 %s5295_s19, 5 }
  0x4e   : > { %v1610_v4 = vrot.slane %v1608_v46, 5  ;;  %3825 = vmatprep.mubr.msk.bf16.mxu0 %vm754_vm5, %v3458_v48  ;;  %v1605_v10 = vor.u32 %v1604_v58, %v1600_v44  ;;  %v642_v61 = vshll.u32 %v4530_v47, 16  ;;  %v646_v12 = vshrl.u32 %v4530_v47, 16  ;;  %v4567_v48 = vld [vmem:[#allocation2 + $0x44] sm:$0x1]  ;;  %s5197_s29 = sadd.s32 %s3378_s13, %s3377_s12 }
  0x4f   : > { %v1596_v5 = vrot.slane %v1595_v54, 4  ;;  %v631_v15 = vsel %vm4395_vm6, %v626_v2, %v630_v28  ;;  %v635_v16 = vrot.slane %v633_v7, 4  ;;  %v638_v17 = vrot.slane %v636_v8, 5  ;;  %500 = vst.msk [vmem:[#allocation2 + $0x68] sm:$0x1] %vm471_vm2, %v496_v36  ;;  %s3379_s19 = sshll.u32 %s5197_s29, 2 }
  0x50   : > { %v652_v50 = vshll.u32 %v4534_v63, 16  ;;  %v3384_v27 = vcombine.low %v621_v52, %v631_v15  ;;  %v1606_v33 = vrot.slane %v1605_v10, 4  ;;  %v644_v34 = vrot.slane %v642_v61, 5  ;;  %v1875_v52 = vld [vmem:[#allocation2 + $0x18] sm:$0xe]  ;;  %s5222_s10 = scalar_lea.vmem %s5265_s5, %s3379_s19 }
  0x51   : > { %v1601_v29 = vsel %vm4395_vm6, %v1596_v5, %v1600_v44  ;;  %v639_v37 = vor.u32 %v638_v17, %v635_v16  ;;  %v648_v42 = vrot.slane %v646_v12, 4  ;;  %v3472_v46 = vrot.slane %v1874_v0, 9  ;;  %v4578_v0 = vld [vmem:[#allocation2 + $0x48] sm:$0xf] }
  0x52   : > { %v654_v41 = vrot.slane %v652_v50, 5  ;;  %3754 = vmatmul.mubr.msk.bf16.gmra.mrb[4].mxu1 %vm754_vm5, %v3384_v27  ;;  %v1611_v44 = vsel %vm4395_vm6, %v1606_v33, %v1610_v4  ;;  %v1910_v54 = vrot.slane %v1908_v23, 4  ;;  %v657_v58 = vshrl.u32 %v4541_v9, 16 }
  0x53   : > { %v660_v2 = vshll.u32 %v4541_v9, 16  ;;  %v3459_v7 = vcombine.low %v1601_v29, %v1611_v44  ;;  %v640_v8 = vrot.slane %v639_v37, 4  ;;  %v649_v5 = vor.u32 %v648_v42, %v644_v34  ;;  %v1876_v37 = vld [vmem:[#allocation2 + $0x24] sm:$0xe] }
  0x54   : > { %v1909_v10 = vsel %vm4562_vm9, %v3472_v46, %v1908_v23  ;;  %v1912_v4 = vsel %vm4562_vm9, %v1910_v54, %v1911_v24  ;;  %v659_v61 = vrot.slane %v657_v58, 4  ;;  %v666_v14 = vshll.u32 %v4555_v20, 16 }
  0x55   : > { %v662_v12 = vrot.slane %v660_v2, 5  ;;  %3826 = vmatmul.mubr.msk.bf16.gmra.mrb[4].mxu0 %vm754_vm5, %v3459_v7  ;;  %v645_v15 = vsel %vm4395_vm6, %v640_v8, %v644_v34  ;;  %v650_v16 = vrot.slane %v649_v5, 4  ;;  %v3481_v17 = vcombine.low %v1909_v10, %v1912_v4  ;;  %v4607_v34 = vld [vmem:[#allocation2 + $0x50] sm:$0x1]  ;;  %v4629_v8 = vld [vmem:[%s5263_s3 + $0xe] sm:$0x3] }
  0x56   : > { %v670_v39 = vshrl.u32 %v4555_v20, 16  ;;  %v668_v40 = vrot.slane %v666_v14, 5  ;;  %v676_v24 = vshll.u32 %v4567_v48, 16  ;;  %v3473_v50 = vrot.slane %v1875_v52, 9 }
  0x57   : > { %v663_v23 = vor.u32 %v662_v12, %v659_v61  ;;  %v655_v27 = vsel %vm4395_vm6, %v650_v16, %v654_v41  ;;  %3839 = vmatprep.mubr.msk.bf16.mxu0 %vm754_vm5, %v3481_v17  ;;  %v1919_v33 = vsel %vm4562_vm9, %v4449_v59, %v1918_v57  ;;  %v681_v36 = vshrl.u32 %v4578_v0, 16  ;;  %v4616_v57 = vld [vmem:[#allocation2 + $0x54] sm:$0xf]  ;;  %v4636_v17 = vld [vmem:[#allocation2 + $0x5c] sm:$0x1] }
  0x58   : > { %v672_v29 = vrot.slane %v670_v39, 4  ;;  %v3385_v42 = vcombine.low %v645_v15, %v655_v27  ;;  %v678_v52 = vrot.slane %v676_v24, 5  ;;  %v1916_v41 = vsel %vm4562_vm9, %v3473_v50, %v1915_v49  ;;  %v4624_v49 = vld [vmem:[#allocation2 + $0x58] sm:$0xf] }
  0x59   : > { %v664_v46 = vrot.slane %v663_v23, 4  ;;  %v3482_v26 = vcombine.low %v1916_v41, %v1919_v33  ;;  %v683_v54 = vrot.slane %v681_v36, 4  ;;  %v684_v58 = vshll.u32 %v4578_v0, 16  ;;  %v501_v33 = vld [vmem:[%s418_s26] sm:$0xf] }
  0x5a   : > { %v673_v44 = vor.u32 %v672_v29, %v668_v40  ;;  %3757 = vmatprep.mubr.msk.bf16.mxu1 %vm754_vm5, %v3385_v42  ;;  %v690_v2 = vshll.u32 %v4597_v25, 16  ;;  %v694_v21 = vshrl.u32 %v4597_v25, 16  ;;  %v700_v7 = vshll.u32 %v4607_v34, 16  ;;  %v1877_v29 = vld [vmem:[#allocation2 + $0x30] sm:$0xe] }
  0x5b   : > { %v669_v59 = vsel %vm4395_vm6, %v664_v46, %v668_v40  ;;  %v686_v10 = vrot.slane %v684_v58, 5  ;;  %v3474_v4 = vrot.slane %v1876_v37, 9  ;;  %v1922_v61 = vrot.slane %v4459_v13, 5  ;;  %505 = vst.msk [vmem:[#allocation2 + $0x6c] sm:$0xf] %vm468_vm1, %v501_v33 }
  0x5c   : > { %v674_v5 = vrot.slane %v673_v44, 4  ;;  %v692_v12 = vrot.slane %v690_v2, 5  ;;  %v696_v14 = vrot.slane %v694_v21, 4  ;;  %v702_v15 = vrot.slane %v700_v7, 5  ;;  %v1878_v7 = vld [vmem:[#allocation2 + $0x3c] sm:$0xe] }
  0x5d   : > { %v1925_v16 = vrot.slane %v4475_v22, 5  ;;  %3840 = vmatmul.mubr.msk.bf16.vlgmr.msra.gmra.mrb[0].mxu0 %vm754_vm5, %v3482_v26  ;;  %v687_v23 = vor.u32 %v686_v10, %v683_v54  ;;  %v1923_v13 = vsel %vm4562_vm9, %v3474_v4, %v1922_v61  ;;  %v1924_v40 = vrot.slane %v1922_v61, 4  ;;  %v503_v54 = vld [vmem:[%s418_s26 + $0x8] sm:$0x1] }
  0x5e   : > { %v679_v39 = vsel %vm4395_vm6, %v674_v5, %v678_v52  ;;  %3856 = vmatpush3.bf16.msra.mxu0 %v4407_v1  ;;  %v697_v50 = vor.u32 %v696_v14, %v692_v12  ;;  %v705_v27 = vshrl.u32 %v4616_v57, 16  ;;  %v708_v22 = vshll.u32 %v4616_v57, 16  ;;  %v502_v52 = vld [vmem:[%s418_s26 + $0x4] sm:$0xf]  ;;  %507 = vst.msk [vmem:[#allocation2 + $0x74] sm:$0x1] %vm471_vm2, %v503_v54 }
  0x5f   : > { %v3386_v24 = vcombine.low %v669_v59, %v679_v39  ;;  %v688_v36 = vrot.slane %v687_v23, 4  ;;  %v1926_v37 = vsel %vm4562_vm9, %v1924_v40, %v1925_v16  ;;  %v714_v42 = vshll.u32 %v4624_v49, 16  ;;  %4047 = vmatprep.subr.msk.bf16.mxu0 %vm779_vm0, %v4629_v8  ;;  %506 = vst.msk [vmem:[#allocation2 + $0x70] sm:$0xf] %vm468_vm1, %v502_v52  ;;  %v4663_v14 = vld [vmem:[#allocation2 + $0x40] sm:$0xf] }
  0x60   : > { %v718_v46 = vshrl.u32 %v4624_v49, 16  ;;  %v698_v1 = vrot.slane %v697_v50, 4  ;;  %v3483_v41 = vcombine.low %v1923_v13, %v1926_v37  ;;  %v707_v44 = vrot.slane %v705_v27, 4  ;;  %v4665_v16 = vld [vmem:[#allocation2 + $0x44] sm:$0x1] }
  0x61   : > { %3758 = vmatmul.mubr.msk.bf16.gmra.mrb[8].mxu1 %vm754_vm5, %v3386_v24  ;;  %v710_v26 = vrot.slane %v708_v22, 5  ;;  %v693_v58 = vsel %vm4395_vm6, %v688_v36, %v692_v12  ;;  %v716_v59 = vrot.slane %v714_v42, 5  ;;  %v724_v21 = vshll.u32 %v4636_v17, 16  ;;  %v4681_v37 = vld [vmem:[#allocation2 + $0x50] sm:$0x1] }
  0x62   : > { %v720_v2 = vrot.slane %v718_v46, 4  ;;  %v703_v5 = vsel %vm4395_vm6, %v698_v1, %v702_v15  ;;  %3843 = vmatprep.mubr.msk.bf16.mxu0 %vm754_vm5, %v3483_v41  ;;  %v3475_v4 = vrot.slane %v1877_v29, 9  ;;  %v1929_v61 = vrot.slane %v4501_v11, 5  ;;  %v4673_v29 = vld [vmem:[#allocation2 + $0x4c] sm:$0xf] }
  0x63   : > { %v711_v10 = vor.u32 %v710_v26, %v707_v44  ;;  %v3387_v12 = vcombine.low %v693_v58, %v703_v5  ;;  %v726_v23 = vrot.slane %v724_v21, 5  ;;  %v1932_v13 = vrot.slane %v4514_v19, 5  ;;  %v1879_v42 = vld [vmem:[#allocation2 + $0x48] sm:$0xe]  ;;  %v4687_v26 = vld [vmem:[#allocation2 + $0x58] sm:$0xf] }
  0x64   : > { %v721_v39 = vor.u32 %v720_v2, %v716_v59  ;;  %v1930_v24 = vsel %vm4562_vm9, %v3475_v4, %v1929_v61  ;;  %v1931_v15 = vrot.slane %v1929_v61, 4  ;;  %v3476_v50 = vrot.slane %v1878_v7, 9  ;;  %v1880_v54 = vld [vmem:[#allocation2 + $0x54] sm:$0xe]  ;;  %v4694_v21 = vld [vmem:[#allocation2 + $0x5c] sm:$0x1] }
  0x65   : > { %v712_v40 = vrot.slane %v711_v10, 4  ;;  %3761 = vmatprep.mubr.msk.bf16.mxu1 %vm754_vm5, %v3387_v12  ;;  %v1936_v11 = vrot.slane %v4663_v14, 5  ;;  %v1939_v22 = vrot.slane %v4665_v16, 5  ;;  %v3397_v36 = vcombine.low %v4361_v30, %v4363_v31  ;;  %5273 = vst [vmem:[#allocation3_spill] sm:$0xff] %v4694_v21  ;;  %v4697_v5 = vld [vmem:[#allocation2 + $0x64] sm:$0xf] }
  0x66   : > { %v722_v27 = vrot.slane %v721_v39, 4  ;;  %v1933_v19 = vsel %vm4562_vm9, %v1931_v15, %v1932_v13  ;;  %v3477_v58 = vrot.slane %v1879_v42, 9  ;;  %v1946_v2 = vrot.slane %v4681_v37, 5  ;;  %v1881_v10 = vld [vmem:[#allocation2 + $0x60] sm:$0xe] }
  0x67   : > { %v717_v33 = vsel %vm4395_vm6, %v712_v40, %v716_v59  ;;  %v3484_v52 = vcombine.low %v1930_v24, %v1933_v19  ;;  %v1937_v1 = vsel %vm4562_vm9, %v3476_v50, %v1936_v11  ;;  %v1938_v41 = vrot.slane %v1936_v11, 4 }
  0x68   : > { %v727_v46 = vsel %vm4395_vm6, %v722_v27, %v726_v23  ;;  %v1943_v59 = vrot.slane %v4673_v29, 5  ;;  %v3478_v12 = vrot.slane %v1880_v54, 9  ;;  %v1950_v39 = vrot.slane %v4687_v26, 5  ;;  %v4703_v23 = vld [vmem:[#allocation2 + $0x68] sm:$0x1] }
  0x69   : > { %v3388_v44 = vcombine.low %v717_v33, %v727_v46  ;;  %3844 = vmatmul.mubr.msk.bf16.gmra.mrb[4].mxu0 %vm754_vm5, %v3484_v52  ;;  %v1940_v30 = vsel %vm4562_vm9, %v1938_v41, %v1939_v22  ;;  %5274 = vst [vmem:[#allocation4_spill] sm:$0xff] %v4703_v23  ;;  %v1080_v13 = vrot.slane %v4399_v60, 5  ;;  %v1178_v40 = vsel %vm779_vm0, %v4470_v18, 0  ;;  %v1045_v22 = vld [vmem:[#allocation2 + $0xc] sm:$0xe] }
  0x6a   : > { %v3485_v7 = vcombine.low %v1937_v1, %v1940_v30  ;;  %v1944_v4 = vsel %vm4562_vm9, %v3477_v58, %v1943_v59  ;;  %v1945_v61 = vrot.slane %v1943_v59, 4  ;;  %v1953_v24 = vrot.slane %v4694_v21, 5  ;;  %v1046_v18 = vld [vmem:[#allocation2 + $0x18] sm:$0xe]  ;;  %v1047_v54 = vld [vmem:[#allocation2 + $0x24] sm:$0xe] }
  0x6b   : > { %3762 = vmatmul.mubr.msk.bf16.gmra.mrb[12].mxu1 %vm754_vm5, %v3388_v44  ;;  %v1951_v50 = vsel %vm4562_vm9, %v3478_v12, %v1950_v39  ;;  %v1952_v27 = vrot.slane %v1950_v39, 4  ;;  %v1957_v11 = vrot.slane %v4697_v5, 5  ;;  %v3398_v33 = vcombine.low %v4391_v55, %v4399_v60  ;;  %v4727_v55 = vld [vmem:[%s5263_s3 + $0x6] sm:$0x3] }
  0x6c   : > { %3767 = vmatprep.mubr.msk.bf16.mxu1 %vm754_vm5, %v3397_v36  ;;  %3847 = vmatprep.mubr.msk.bf16.mxu0 %vm754_vm5, %v3485_v7  ;;  %v1947_v15 = vsel %vm4562_vm9, %v1945_v61, %v1946_v2  ;;  %v3479_v36 = vrot.slane %v1881_v10, 9  ;;  %v1960_v42 = vrot.slane %v4703_v23, 5  ;;  %v1083_v46 = vrot.slane %v4409_v6, 5  ;;  %v1048_v2 = vld [vmem:[#allocation2 + $0x30] sm:$0xe] }
  0x6d   : > { %v3486_v19 = vcombine.low %v1944_v4, %v1947_v15  ;;  %v3399_v52 = vcombine.low %v4437_v45, %v4443_v51  ;;  %v1954_v1 = vsel %vm4562_vm9, %v1952_v27, %v1953_v24  ;;  %v1959_v41 = vrot.slane %v1957_v11, 4  ;;  %v4965_v23 = vld [vmem:[#allocation2 + $0x70] sm:$0xf] }
  0x6e   : > { %v3487_v44 = vcombine.low %v1951_v50, %v1954_v1  ;;  %v3414_v60 = vrot.slane %v1045_v22, 9  ;;  %v1082_v30 = vrot.slane %v1080_v13, 4  ;;  %v3415_v58 = vrot.slane %v1046_v18, 9  ;;  %v4093_v50 = vld [vmem:[#allocation2 + $0x18] sm:$0xff]  }
  0x6f   : > { %v1958_v6 = vsel %vm4562_vm9, %v3479_v36, %v1957_v11  ;;  %v1961_v45 = vsel %vm4562_vm9, %v1959_v41, %v1960_v42  ;;  %v1087_v59 = vrot.slane %v4443_v51, 5  ;;  %v1090_v4 = vrot.slane %v4451_v62, 5  ;;  %v1044_v36 = vld [vmem:[#allocation2] sm:$0xe] }
  0x70   : > { %v4739_v7 = vsel %vm4562_vm9, %v3414_v60, %v1080_v13  ;;  %v4743_v10 = vsel %vm4562_vm9, %v1082_v30, %v1083_v46  ;;  %v3416_v61 = vrot.slane %v1047_v54, 9  ;;  %v3488_v13 = vcombine.low %v1958_v6, %v1961_v45  ;;  %v4094_v30 = vld [vmem:[#allocation2 + $0x24] sm:$0xff]   ;;  %v4796_v6 = vld [vmem:[#allocation2 + $0x1c] sm:$0xf] }
  0x71   : > { %3848 = vmatmul.mubr.msk.bf16.gmra.mrb[8].mxu0 %vm754_vm5, %v3486_v19  ;;  %v3423_v51 = vcombine.low %v4739_v7, %v4743_v10  ;;  %v4752_v12 = vsel %vm4562_vm9, %v3415_v58, %v1087_v59  ;;  %v1089_v39 = vrot.slane %v1087_v59, 4  ;;  %v1097_v24 = vrot.slane %v4493_v53, 5  ;;  %v2327_v58 = vld [vmem:[#allocation2 + $0x18] sm:$0xf]  ;;  %v4100_v7 = vld [vmem:[#allocation2 + $0x6c] sm:$0xff]  }
  0x72   : > { %3851 = vmatprep.mubr.msk.bf16.mxu0 %vm754_vm5, %v3487_v44  ;;  %v3417_v15 = vrot.slane %v1048_v2, 9  ;;  %v3400_v62 = vcombine.low %v4481_v35, %v4483_v43  ;;  %v1101_v11 = vrot.slane %v4530_v47, 5  ;;  %v1104_v22 = vrot.slane %v4534_v63, 5 }
  0x73   : > { %3768 = vmatmul.mubr.msk.bf16.vlgmr.msra.gmra.mrb[0].mxu1 %vm754_vm5, %v3398_v33  ;;  %v4760_v27 = vsel %vm4562_vm9, %v1089_v39, %v1090_v4  ;;  %v3401_v33 = vcombine.low %v4525_v38, %v4530_v47  ;;  %v1073_v42 = vrot.slane %v4363_v31, 5  ;;  %v1076_v41 = vrot.slane %v4365_v32, 5  ;;  %v1050_v4 = vld [vmem:[#allocation2 + $0x48] sm:$0xe] }
  0x74   : > { %3784 = vmatpush3.bf16.msra.mxu1 %v1178_v40  ;;  %3771 = vmatprep.mubr.msk.bf16.mxu1 %vm754_vm5, %v3399_v52  ;;  %v1094_v40 = vrot.slane %v4483_v43, 5  ;;  %v3424_v19 = vcombine.low %v4752_v12, %v4760_v27  ;;  %v1049_v43 = vld [vmem:[#allocation2 + $0x3c] sm:$0xe]  ;;  %v4775_v18 = vsel %vm4562_vm9, %v3417_v15, %v1101_v11  ;;  %v1103_v63 = vrot.slane %v1101_v11, 4  ;;  %v4922_v12 = vld [vmem:[#allocation2 + $0x44] sm:$0x1] }
  0x75   : > { %4042 = vmatprep.subr.msk.bf16.mxu1 %vm779_vm0, %v4727_v55  ;;  %v3418_v46 = vrot.slane %v1049_v43, 9  ;;  %v3413_v52 = vrot.slane %v1044_v36, 9  ;;  %v1075_v44 = vrot.slane %v1073_v42, 4  ;;  %v1108_v54 = vrot.slane %v4555_v20, 5 }
  0x76   : > { %v4770_v53 = vsel %vm4562_vm9, %v3416_v61, %v1094_v40  ;;  %v1096_v35 = vrot.slane %v1094_v40, 4  ;;  %v4788_v31 = vsel %vm4562_vm9, %v1103_v63, %v1104_v22  ;;  %v1111_v60 = vrot.slane %v4567_v48, 5  ;;  %v4095_v48 = vld [vmem:[#allocation2 + $0x30] sm:$0xff]  }
  0x77   : > { %v3402_v45 = vcombine.low %v4541_v9, %v4555_v20  ;;  %v4802_v59 = vsel %vm4562_vm9, %v3418_v46, %v1108_v54  ;;  %v1110_v2 = vrot.slane %v1108_v54, 4  ;;  %v2594_v32 = vsel %vm779_vm0, %v4629_v8, 0  ;;  %v4815_v40 = vld [vmem:[%s5263_s3 + $0x10] sm:$0x3] }
  0x78   : > { %v4780_v38 = vsel %vm4562_vm9, %v1096_v35, %v1097_v24  ;;  %v3403_v61 = vcombine.low %v4578_v0, %v4597_v25  ;;  %v1074_v39 = vsel %vm4562_vm9, %v3413_v52, %v1073_v42  ;;  %v2352_v9 = vshrl.u32 %v2327_v58, 16  ;;  %v4832_v35 = vld [vmem:[#allocation2 + $0x28] sm:$0xf]  ;;  %v2333_v46 = vld [vmem:[#allocation2 + $0x30] sm:$0xf] }
  0x79   : > { %3852 = vmatmul.mubr.msk.bf16.gmra.mrb[12].mxu0 %vm754_vm5, %v3488_v13  ;;  %v1077_v13 = vsel %vm4562_vm9, %v1075_v44, %v1076_v41  ;;  %v2355_v20 = vshll.u32 %v2327_v58, 16  ;;  %v4819_v8 = vsel %vm4562_vm9, %v1110_v2, %v1111_v60  ;;  %v2361_v0 = vshll.u32 %v4796_v6, 16  ;;  %v1051_v52 = vld [vmem:[#allocation2 + $0x54] sm:$0xe] }
  0x7a   : > { %3857 = vmatprep.mubr.msk.bf16.mxu0 %vm754_vm5, %v4093_v50  ;;  %v2365_v24 = vshrl.u32 %v4796_v6, 16  ;;  %v2330_v50 = vld [vmem:[#allocation2 + $0x24] sm:$0xf]  ;;  %v1115_v11 = vrot.slane %v4597_v25, 5  ;;  %v3404_v22 = vcombine.low %v4616_v57, %v4624_v49  ;;  %v1118_v43 = vrot.slane %v4607_v34, 5  ;;  %v4097_v34 = vld [vmem:[#allocation2 + $0x48] sm:$0xff]  }
  0x7b   : > { %3772 = vmatmul.mubr.msk.bf16.gmra.mrb[4].mxu1 %vm754_vm5, %v3400_v62  ;;  %v3419_v62 = vrot.slane %v1050_v4, 9  ;;  %v3422_v36 = vcombine.low %v1074_v39, %v1077_v13  ;;  %v2354_v42 = vrot.slane %v2352_v9, 4  ;;  %v2357_v41 = vrot.slane %v2355_v20, 5  ;;  %v4843_v60 = vld [vmem:[#allocation2 + $0x34] sm:$0xf] }
  0x7c   : > { %3775 = vmatprep.mubr.msk.bf16.mxu1 %vm754_vm5, %v3401_v33  ;;  %v4096_v33 = vld [vmem:[#allocation2 + $0x3c] sm:$0xff]   ;;  %v1117_v63 = vrot.slane %v1115_v11, 4  ;;  %v4841_v44 = vrot.slane %v2361_v0, 5  ;;  %v2367_v57 = vrot.slane %v2365_v24, 4  ;;  %v2376_v54 = vshrl.u32 %v2330_v50, 16 }
  0x7d   : > { %v4839_v25 = vsel %vm4562_vm9, %v3419_v62, %v1115_v11  ;;  %v2379_v58 = vshll.u32 %v2330_v50, 16  ;;  %v2389_v2 = vshrl.u32 %v4832_v35, 16  ;;  %v3420_v39 = vrot.slane %v1051_v52, 9 }
  0x7e   : > { %v4851_v4 = vsel %vm4562_vm9, %v1117_v63, %v1118_v43  ;;  %v2409_v13 = vshll.u32 %v4843_v60, 16  ;;  %v2413_v9 = vshrl.u32 %v4843_v60, 16  ;;  %v1122_v20 = vrot.slane %v4624_v49, 5 }
  0x7f   : > { %v1125_v0 = vrot.slane %v4636_v17, 5  ;;  %v1377_v24 = vsel %vm779_vm0, %v4727_v55, 0  ;;  %v2358_v62 = vor.u32 %v2357_v41, %v2354_v42  ;;  %v2368_v50 = vor.u32 %v2367_v57, %v4841_v44  ;;  %v4873_v41 = vld [vmem:[#allocation2 + $0x2c] sm:$0x1] }
  0x80   : > { %v2378_v43 = vrot.slane %v2376_v54, 4  ;;  %v2381_v63 = vrot.slane %v2379_v58, 5  ;;  %v4868_v49 = vsel %vm4562_vm9, %v3420_v39, %v1122_v20  ;;  %v1124_v17 = vrot.slane %v1122_v20, 4  ;;  %v4099_v39 = vld [vmem:[#allocation2 + $0x60] sm:$0xff]   ;;  %v4892_v58 = vld [vmem:[#allocation2 + $0x4c] sm:$0xf] }
  0x81   : > { %3858 = vmatmul.mubr.msk.bf16.vlgmr.msra.gmra.mrb[0].mxu0 %vm754_vm5, %v4094_v30  ;;  %v4845_v30 = vld [vmem:[#allocation2 + $0x20] sm:$0x1]  ;;  %v2391_v42 = vrot.slane %v2389_v2, 4  ;;  %v4877_v57 = vrot.slane %v2409_v13, 5  ;;  %v2415_v54 = vrot.slane %v2413_v9, 4  ;;  %v2369_v20 = vrot.slane %v2368_v50, 4 }
  0x82   : > { %3874 = vmatpush3.bf16.msra.mxu0 %v2594_v32  ;;  %3861 = vmatprep.mubr.msk.bf16.mxu0 %vm754_vm5, %v4095_v48  ;;  %v2403_v48 = vshll.u32 %v2333_v46, 16  ;;  %v2371_v11 = vshll.u32 %v4845_v30, 16  ;;  %v2336_v2 = vld [vmem:[#allocation2 + $0x3c] sm:$0xf]  ;;  %v2382_v32 = vor.u32 %v2381_v63, %v2378_v43  ;;  %v2339_v9 = vld [vmem:[#allocation2 + $0x48] sm:$0xf] }
  0x83   : > { %3776 = vmatmul.mubr.msk.bf16.gmra.mrb[8].mxu1 %vm754_vm5, %v3402_v45  ;;  %4048 = vmatprep.subr.msk.bf16.mxu0 %vm779_vm0, %v4815_v40  ;;  %v2385_v45 = vshll.u32 %v4832_v35, 16  ;;  %v2424_v1 = vshrl.u32 %v2336_v2, 16  ;;  %v2427_v47 = vshll.u32 %v2336_v2, 16  ;;  %v2448_v43 = vshrl.u32 %v2339_v9, 16 }
  0x84   : > { %3779 = vmatprep.mubr.msk.bf16.mxu1 %vm754_vm5, %v3403_v61  ;;  %v2400_v61 = vshrl.u32 %v2333_v46, 16  ;;  %v2405_v52 = vrot.slane %v2403_v48, 5  ;;  %v2373_v13 = vrot.slane %v2371_v11, 5  ;;  %v2451_v63 = vshll.u32 %v2339_v9, 16 }
  0x85   : > { %v4871_v55 = vrot.slane %v2385_v45, 5  ;;  %v2416_v45 = vor.u32 %v2415_v54, %v4877_v57 }
  0x86   : > { %v2402_v46 = vrot.slane %v2400_v61, 4  ;;  %v4886_v61 = vld [vmem:[#allocation2 + $0x40] sm:$0xf] }
  0x87   : > { %v2392_v15 = vor.u32 %v2391_v42, %v4871_v55  ;;  %v2433_v48 = vshll.u32 %v4886_v61, 16  ;;  %v2437_v11 = vshrl.u32 %v4886_v61, 16  ;;  %v2374_v42 = vsel %vm4395_vm6, %v2369_v20, %v2373_v13  ;;  %v4173_v13 = vld [vmem:[%s5263_s3 + $0x8] sm:$0x3] }
  0x88   : > { %v2417_v2 = vrot.slane %v2416_v45, 4  ;;  %v2429_v20 = vrot.slane %v2427_v47, 5  ;;  %v4924_v45 = vld [vmem:[#allocation2 + $0x50] sm:$0x1] }
  0x89   : > { %3862 = vmatmul.mubr.msk.bf16.gmra.mrb[4].mxu0 %vm754_vm5, %v4096_v33  ;;  %v4098_v33 = vld [vmem:[#allocation2 + $0x54] sm:$0xff]   ;;  %v2393_v10 = vrot.slane %v2392_v15, 4  ;;  %v2439_v27 = vrot.slane %v2437_v11, 4  ;;  %v2453_v15 = vrot.slane %v2451_v63, 5 }
  0x8a   : > { %3865 = vmatprep.mubr.msk.bf16.mxu0 %vm754_vm5, %v4097_v34  ;;  %v4881_v34 = vsel %vm4562_vm9, %v1124_v17, %v1125_v0  ;;  %v2395_v0 = vshll.u32 %v4873_v41, 16  ;;  %v2406_v17 = vor.u32 %v2405_v52, %v2402_v46  ;;  %v2383_v46 = vrot.slane %v2382_v32, 4 }
  0x8b   : > { %3780 = vmatmul.mubr.msk.bf16.gmra.mrb[12].mxu1 %vm754_vm5, %v3404_v22  ;;  %v4875_v22 = vld [vmem:[#allocation2 + $0x38] sm:$0x1]  ;;  %v2461_v52 = vshrl.u32 %v4892_v58, 16  ;;  %v4914_v32 = vrot.slane %v2433_v48, 5 }
  0x8c   : > { %3785 = vmatprep.mubr.msk.bf16.mxu1 %vm754_vm5, %v3422_v36  ;;  %v2359_v36 = vrot.slane %v2358_v62, 4  ;;  %v2419_v62 = vshll.u32 %v4875_v22, 16  ;;  %v2407_v54 = vrot.slane %v2406_v17, 4  ;;  %v2388_v17 = vsel %vm4395_vm6, %v2383_v46, %v4871_v55 }
  0x8d   : > { %v2440_v55 = vor.u32 %v2439_v27, %v4914_v32 }
  0x8e   : > { %v2364_v50 = vsel %vm4395_vm6, %v2359_v36, %v4841_v44  ;;  %v2342_v44 = vld [vmem:[#allocation2 + $0x54] sm:$0xf]  ;;  %v2421_v36 = vrot.slane %v2419_v62, 5 }
  0x8f   : > { %v2472_v9 = vshrl.u32 %v2342_v44, 16  ;;  %v2475_v48 = vshll.u32 %v2342_v44, 16  ;;  %v2467_v44 = vshll.u32 %v4924_v45, 16 }
  0x90   : > { %v2422_v63 = vsel %vm4395_vm6, %v2417_v2, %v2421_v36 }
  0x91   : > { %3866 = vmatmul.mubr.msk.bf16.gmra.mrb[8].mxu0 %vm754_vm5, %v4098_v33  ;;  %v2457_v33 = vshll.u32 %v4892_v58, 16 }
  0x92   : > { %3869 = vmatprep.mubr.msk.bf16.mxu0 %vm754_vm5, %v4099_v39  ;;  %v2426_v39 = vrot.slane %v2424_v1, 4  ;;  %v2463_v1 = vrot.slane %v2461_v52, 4  ;;  %v4941_v52 = vld [vmem:[#allocation2 + $0x64] sm:$0xf] }
  0x93   : > { %3786 = vmatmul.mubr.msk.bf16.vlgmr.msra.gmra.mrb[0].mxu1 %vm754_vm5, %v3423_v51  ;;  %v2397_v51 = vrot.slane %v2395_v0, 5  ;;  %v3515_v0 = vcombine.low %v2364_v50, %v2374_v42  ;;  %v4926_v47 = vrot.slane %v2457_v33, 5  ;;  %v2412_v50 = vsel %vm4395_vm6, %v2407_v54, %v4877_v57 }
  0x94   : > { %3802 = vmatpush3.bf16.msra.mxu1 %v1377_v24  ;;  %3789 = vmatprep.mubr.msk.bf16.mxu1 %vm754_vm5, %v3424_v19  ;;  %v4920_v24 = vld [vmem:[#allocation2 + $0x58] sm:$0xf]  ;;  %v2450_v19 = vrot.slane %v2448_v43, 4  ;;  %v2345_v43 = vld [vmem:[#allocation2 + $0x60] sm:$0xf]  ;;  %v2430_v42 = vor.u32 %v2429_v20, %v2426_v39  ;;  %v2443_v33 = vshll.u32 %v4922_v12, 16 }
  0x95   : > { %4044 = vmatprep.subr.msk.bf16.mxu1 %vm779_vm0, %v4173_v13  ;;  %v2398_v62 = vsel %vm4395_vm6, %v2393_v10, %v2397_v51  ;;  %v2481_v13 = vshll.u32 %v4920_v24, 16  ;;  %v2485_v11 = vshrl.u32 %v4920_v24, 16  ;;  %v2474_v10 = vrot.slane %v2472_v9, 4  ;;  %v4956_v39 = vld [vmem:[#allocation2 + $0x5c] sm:$0x1] }
  0x96   : > { %v2454_v46 = vor.u32 %v2453_v15, %v2450_v19  ;;  %v5275_v51 = vcombine.low %v4770_v53, %v4780_v38  ;;  %v2464_v57 = vor.u32 %v2463_v1, %v4926_v47  ;;  %v2477_v54 = vrot.slane %v2475_v48, 5 }
  0x97   : > { %v2496_v36 = vshrl.u32 %v2345_v43, 16  ;;  %v2499_v2 = vshll.u32 %v2345_v43, 16  ;;  %v4958_v20 = vrot.slane %v2481_v13, 5  ;;  %v2487_v27 = vrot.slane %v2485_v11, 4  ;;  %v2348_v43 = vld [vmem:[#allocation2 + $0x6c] sm:$0xf] }
  0x98   : > { %v2505_v53 = vshll.u32 %v4941_v52, 16  ;;  %v2509_v38 = vshrl.u32 %v4941_v52, 16  ;;  %v3516_v19 = vcombine.low %v2388_v17, %v2398_v62  ;;  %v2848_v15 = vsel %vm779_vm0, %v4815_v40, 0 }
  0x99   : > { %3870 = vmatmul.mubr.msk.bf16.gmra.mrb[12].mxu0 %vm754_vm5, %v4100_v7  ;;  %v5276_v7 = vcombine.low %v4775_v18, %v4788_v31  ;;  %v3517_v9 = vcombine.low %v2412_v50, %v2422_v63  ;;  %v2431_v1 = vrot.slane %v2430_v42, 4  ;;  %v2441_v48 = vrot.slane %v2440_v55, 4  ;;  %v4976_v55 = vld [vmem:[#allocation2 + $0x68] sm:$0x1] }
  0x9a   : > { %3875 = vmatprep.mubr.msk.bf16.mxu0 %vm754_vm5, %v3515_v0  ;;  %v2445_v0 = vrot.slane %v2443_v33, 5  ;;  %v2455_v18 = vrot.slane %v2454_v46, 4  ;;  %v2469_v31 = vrot.slane %v2467_v44, 5  ;;  %v2491_v13 = vshll.u32 %v4956_v39, 16 }
  0x9b   : > { %3790 = vmatmul.mubr.msk.bf16.gmra.mrb[4].mxu1 %vm754_vm5, %v5275_v51  ;;  %v2478_v51 = vor.u32 %v2477_v54, %v2474_v10  ;;  %v2501_v11 = vrot.slane %v2499_v2, 5  ;;  %v2465_v21 = vrot.slane %v2464_v57, 4  ;;  %v2488_v17 = vor.u32 %v2487_v27, %v4958_v20 }
  0x9c   : > { %3793 = vmatprep.mubr.msk.bf16.mxu1 %vm754_vm5, %v5276_v7  ;;  %v2498_v7 = vrot.slane %v2496_v36, 4  ;;  %v4968_v62 = vrot.slane %v2505_v53, 5  ;;  %v2511_v40 = vrot.slane %v2509_v38, 4  ;;  %v5277_v50 = vshll.u32 %v4673_v29, 16 }
  0x9d   : > { %v5278_v42 = vshrl.u32 %v4673_v29, 16  ;;  %v2520_v46 = vshrl.u32 %v2348_v43, 16  ;;  %v2523_v44 = vshll.u32 %v2348_v43, 16  ;;  %v2436_v10 = vsel %vm4395_vm6, %v2431_v1, %v4914_v32  ;;  %v5004_v1 = vld [vmem:[#allocation2 + $0x74] sm:$0x1] }
  0x9e   : > { %v4972_v63 = vrot.slane %v5277_v50, 5  ;;  %v2446_v57 = vsel %vm4395_vm6, %v2441_v48, %v2445_v0  ;;  %v2529_v54 = vshll.u32 %v4965_v23, 16  ;;  %v2533_v36 = vshrl.u32 %v4965_v23, 16 }
  0x9f   : > { %v1652_v33 = vrot.slane %v5278_v42, 4  ;;  %v5279_v29 = vcombine.low %v4802_v59, %v4819_v8  ;;  %v2460_v2 = vsel %vm4395_vm6, %v2455_v18, %v4926_v47  ;;  %v2479_v27 = vrot.slane %v2478_v51, 4  ;;  %v4101_v51 = vld [vmem:[#allocation2 + $0xc] sm:$0xff]   ;;  %v1507_v42 = vld [vmem:[#allocation2 + $0x48] sm:$0xf] }
  0xa0   : > { %v2493_v53 = vrot.slane %v2491_v13, 5  ;;  %v2502_v32 = vor.u32 %v2501_v11, %v2498_v7  ;;  %v5280_v38 = vcombine.low %v4839_v25, %v4851_v4  ;;  %v2470_v59 = vsel %vm4395_vm6, %v2465_v21, %v2469_v31 }
  0xa1   : > { %3876 = vmatmul.mubr.msk.bf16.vlgmr.msra.gmra.mrb[0].mxu0 %vm754_vm5, %v3516_v19  ;;  %v2489_v8 = vrot.slane %v2488_v17, 4  ;;  %v2512_v19 = vor.u32 %v2511_v40, %v4968_v62  ;;  %v1653_v47 = vor.u32 %v1652_v33, %v4972_v63  ;;  %v1656_v0 = vshll.u32 %v4681_v37, 16 }
  0xa2   : > { %3892 = vmatpush3.bf16.msra.mxu0 %v2848_v15  ;;  %3879 = vmatprep.mubr.msk.bf16.mxu0 %vm754_vm5, %v3517_v9  ;;  %v2515_v15 = vshll.u32 %v4976_v55, 16  ;;  %v2522_v48 = vrot.slane %v2520_v46, 4  ;;  %v2525_v25 = vrot.slane %v2523_v44, 5  ;;  %v3518_v4 = vcombine.low %v2436_v10, %v2446_v57  ;;  %v2709_v46 = vld [vmem:[#allocation2 + $0x18] sm:$0xe] }
  0xa3   : > { %3794 = vmatmul.mubr.msk.bf16.gmra.mrb[8].mxu1 %vm754_vm5, %v5279_v29  ;;  %v5006_v18 = vrot.slane %v2529_v54, 5  ;;  %v2535_v9 = vrot.slane %v2533_v36, 4  ;;  %v3519_v43 = vcombine.low %v2460_v2, %v2470_v59  ;;  %v2484_v21 = vsel %vm4395_vm6, %v2479_v27, %v4958_v20 }
  0xa4   : > { %3797 = vmatprep.mubr.msk.bf16.mxu1 %vm754_vm5, %v5280_v38  ;;  %v2503_v31 = vrot.slane %v2502_v32, 4  ;;  %v2494_v13 = vsel %vm4395_vm6, %v2489_v8, %v2493_v53  ;;  %v2513_v7 = vrot.slane %v2512_v19, 4  ;;  %v2517_v37 = vrot.slane %v2515_v15, 5  ;;  %v4103_v19 = vld [vmem:[#allocation2 + $0x24] sm:$0xff]   ;;  %v1504_v15 = vld [vmem:[#allocation2 + $0x3c] sm:$0xf] }
  0xa5   : > { %v2539_v11 = vshll.u32 %v5004_v1, 16  ;;  %v1654_v17 = vrot.slane %v1653_v47, 4  ;;  %v1658_v40 = vrot.slane %v1656_v0, 5  ;;  %v2526_v50 = vor.u32 %v2525_v25, %v2522_v48 }
  0xa6   : > { %v2536_v33 = vor.u32 %v2535_v9, %v5006_v18  ;;  %v2743_v20 = vrot.slane %v4796_v6, 5  ;;  %v5281_v44 = vcombine.low %v4868_v49, %v4881_v34  ;;  %v3520_v10 = vcombine.low %v2484_v21, %v2494_v13 }
  0xa7   : > { %v2508_v57 = vsel %vm4395_vm6, %v2503_v31, %v4968_v62  ;;  %v2518_v54 = vsel %vm4395_vm6, %v2513_v7, %v2517_v37  ;;  %v2541_v36 = vrot.slane %v2539_v11, 5  ;;  %v1637_v29 = vshrl.u32 %v1507_v42, 16  ;;  %v4102_v62 = vld [vmem:[#allocation2 + $0x18] sm:$0xff]  }
  0xa8   : > { %v1640_v6 = vshll.u32 %v1507_v42, 16  ;;  %v2527_v2 = vrot.slane %v2526_v50, 4  ;;  %v3531_v27 = vrot.slane %v2709_v46, 9  ;;  %v2746_v49 = vrot.slane %v4845_v30, 5  ;;  %v2710_v30 = vld [vmem:[#allocation2 + $0x24] sm:$0xe] }
  0xa9   : > { %3880 = vmatmul.mubr.msk.bf16.gmra.mrb[4].mxu0 %vm754_vm5, %v3518_v4  ;;  %v1659_v34 = vsel %vm4395_vm6, %v1654_v17, %v1658_v40  ;;  %v2537_v53 = vrot.slane %v2536_v33, 4  ;;  %v2745_v32 = vrot.slane %v2743_v20, 4  ;;  %v1639_v38 = vrot.slane %v1637_v29, 4  ;;  %v4104_v46 = vld [vmem:[#allocation2 + $0x30] sm:$0xff]  }
  0xaa   : > { %3883 = vmatprep.mubr.msk.bf16.mxu0 %vm754_vm5, %v3519_v43  ;;  %v1642_v59 = vrot.slane %v1640_v6, 5  ;;  %v3521_v8 = vcombine.low %v2508_v57, %v2518_v54  ;;  %v2532_v0 = vsel %vm4395_vm6, %v2527_v2, %v5006_v18  ;;  %v2744_v48 = vsel %vm4562_vm9, %v3531_v27, %v2743_v20  ;;  %v2711_v43 = vld [vmem:[#allocation2 + $0x30] sm:$0xe]  ;;  %v4105_v57 = vld [vmem:[#allocation2 + $0x3c] sm:$0xff]   ;;  %v1510_v6 = vld [vmem:[#allocation2 + $0x54] sm:$0xf] }
  0xab   : > { %3798 = vmatmul.mubr.msk.bf16.gmra.mrb[12].mxu1 %vm754_vm5, %v5281_v44  ;;  %v2750_v25 = vrot.slane %v4832_v35, 5  ;;  %v2542_v4 = vsel %vm4395_vm6, %v2537_v53, %v2541_v36  ;;  %v2747_v9 = vsel %vm4562_vm9, %v2745_v32, %v2746_v49  ;;  %v2757_v21 = vrot.slane %v4843_v60, 5  ;;  %v2712_v54 = vld [vmem:[#allocation2 + $0x3c] sm:$0xe] }
  0xac   : > { %3803 = vmatprep.mubr.msk.bf16.mxu1 %vm754_vm5, %v4101_v51  ;;  %v1643_v47 = vor.u32 %v1642_v59, %v1639_v38  ;;  %v1613_v18 = vshrl.u32 %v1504_v15, 16  ;;  %v1616_v51 = vshll.u32 %v1504_v15, 16  ;;  %v1622_v35 = vshll.u32 %v4663_v14, 16 }
  0xad   : > { %v1626_v13 = vshrl.u32 %v4663_v14, 16  ;;  %v3532_v7 = vrot.slane %v2710_v30, 9  ;;  %v2752_v37 = vrot.slane %v2750_v25, 4  ;;  %v2753_v11 = vrot.slane %v4873_v41, 5 }
  0xae   : > { %v1644_v31 = vrot.slane %v1643_v47, 4  ;;  %v3533_v17 = vrot.slane %v2711_v43, 9  ;;  %v3522_v50 = vcombine.low %v2532_v0, %v2542_v4  ;;  %v3540_v42 = vcombine.low %v2744_v48, %v2747_v9  ;;  %v4106_v48 = vld [vmem:[#allocation2 + $0x48] sm:$0xff]   ;;  %v4107_v9 = vld [vmem:[#allocation2 + $0x54] sm:$0xff]  }
  0xaf   : > { %v2759_v33 = vrot.slane %v2757_v21, 4  ;;  %v2760_v14 = vrot.slane %v4875_v22, 5  ;;  %v1618_v20 = vrot.slane %v1616_v51, 5  ;;  %v5056_v44 = vrot.slane %v1622_v35, 5 }
  0xb0   : > { %v1649_v60 = vsel %vm4395_vm6, %v1644_v31, %v4972_v63  ;;  %v2751_v63 = vsel %vm4562_vm9, %v3532_v7, %v2750_v25  ;;  %v2754_v41 = vsel %vm4562_vm9, %v2752_v37, %v2753_v11  ;;  %v2758_v36 = vsel %vm4562_vm9, %v3533_v17, %v2757_v21  ;;  %v2714_v37 = vld [vmem:[#allocation2 + $0x54] sm:$0xe] }
  0xb1   : > { %3884 = vmatmul.mubr.msk.bf16.gmra.mrb[8].mxu0 %vm754_vm5, %v3520_v10  ;;  %v5053_v40 = vcombine.low %v1649_v60, %v1659_v34  ;;  %v1628_v10 = vrot.slane %v1626_v13, 4  ;;  %v2761_v22 = vsel %vm4562_vm9, %v2759_v33, %v2760_v14  ;;  %v2764_v29 = vrot.slane %v4886_v61, 5  ;;  %v2713_v34 = vld [vmem:[#allocation2 + $0x48] sm:$0xe] }
  0xb2   : > { %3887 = vmatprep.mubr.msk.bf16.mxu0 %vm754_vm5, %v3521_v8  ;;  %v1632_v49 = vshll.u32 %v4665_v16, 16  ;;  %v2771_v53 = vrot.slane %v4892_v58, 5  ;;  %v3541_v32 = vcombine.low %v2751_v63, %v2754_v41  ;;  %v3534_v38 = vrot.slane %v2712_v54, 9 }
  0xb3   : > { %3804 = vmatmul.mubr.msk.bf16.vlgmr.msra.gmra.mrb[0].mxu1 %vm754_vm5, %v4102_v62  ;;  %v1629_v27 = vor.u32 %v1628_v10, %v5056_v44  ;;  %v2767_v59 = vrot.slane %v4922_v12, 5  ;;  %v1661_v61 = vshrl.u32 %v1510_v6, 16  ;;  %v1664_v62 = vshll.u32 %v1510_v6, 16 }
  0xb4   : > { %3910 = vmatpush3.bf16.msra.mxu1 %v4286_v3  ;;  %3807 = vmatprep.mubr.msk.bf16.mxu1 %vm754_vm5, %v4103_v19  ;;  %v1615_v3 = vrot.slane %v1613_v18, 4  ;;  %v1670_v8 = vshll.u32 %v4687_v26, 16  ;;  %v1674_v19 = vshrl.u32 %v4687_v26, 16  ;;  %v3542_v15 = vcombine.low %v2758_v36, %v2761_v22  ;;  %v1513_v18 = vld [vmem:[#allocation2 + $0x60] sm:$0xf] }
  0xb5   : > { %v2766_v47 = vrot.slane %v2764_v29, 4  ;;  %v3535_v0 = vrot.slane %v2713_v34, 9  ;;  %v2774_v16 = vrot.slane %v4924_v45, 5  ;;  %v1630_v58 = vrot.slane %v1629_v27, 4 }
  0xb6   : > { %v1619_v2 = vor.u32 %v1618_v20, %v1615_v3  ;;  %v1634_v25 = vrot.slane %v1632_v49, 5  ;;  %v2773_v4 = vrot.slane %v2771_v53, 4  ;;  %v1663_v43 = vrot.slane %v1661_v61, 4  ;;  %v5282_v20 = vld [vmem:[#allocation3_spill] sm:$0xff] }
  0xb7   : > { %v1666_v21 = vrot.slane %v1664_v62, 5  ;;  %v1672_v12 = vrot.slane %v1670_v8, 5  ;;  %v1676_v31 = vrot.slane %v1674_v19, 4  ;;  %v2765_v26 = vsel %vm4562_vm9, %v3534_v38, %v2764_v29  ;;  %v5283_v8 = vld [vmem:[#allocation4_spill] sm:$0xff] }
  0xb8   : > { %v1620_v30 = vrot.slane %v1619_v2, 4  ;;  %v2768_v51 = vsel %vm4562_vm9, %v2766_v47, %v2767_v59  ;;  %v2772_v45 = vsel %vm4562_vm9, %v3535_v0, %v2771_v53  ;;  %v2778_v35 = vrot.slane %v4920_v24, 5  ;;  %v2715_v24 = vld [vmem:[#allocation2 + $0x60] sm:$0xe] }
  0xb9   : > { %3888 = vmatmul.mubr.msk.bf16.gmra.mrb[12].mxu0 %vm754_vm5, %v3522_v50  ;;  %v1635_v7 = vsel %vm4395_vm6, %v1630_v58, %v1634_v25  ;;  %v2775_v60 = vsel %vm4562_vm9, %v2773_v4, %v2774_v16  ;;  %v2785_v11 = vrot.slane %v4941_v52, 5  ;;  %v1685_v17 = vshrl.u32 %v1513_v18, 16  ;;  %v4108_v52 = vld [vmem:[#allocation2 + $0x60] sm:$0xff]  }
  0xba   : > { %3893 = vmatprep.mubr.msk.bf16.mxu0 %vm754_vm5, %v3540_v42  ;;  %v1625_v13 = vsel %vm4395_vm6, %v1620_v30, %v5056_v44  ;;  %v1688_v50 = vshll.u32 %v1513_v18, 16  ;;  %v1694_v42 = vshll.u32 %v4697_v5, 16  ;;  %v1698_v33 = vshrl.u32 %v4697_v5, 16 }
  0xbb   : > { %3808 = vmatmul.mubr.msk.bf16.gmra.mrb[4].mxu1 %vm754_vm5, %v4104_v46  ;;  %v3543_v14 = vcombine.low %v2765_v26, %v2768_v51  ;;  %v1667_v46 = vor.u32 %v1666_v21, %v1663_v43  ;;  %v1677_v3 = vor.u32 %v1676_v31, %v1672_v12  ;;  %v1680_v44 = vshll.u32 %v5282_v20, 16 }
  0xbc   : > { %3811 = vmatprep.mubr.msk.bf16.mxu1 %vm754_vm5, %v4105_v57  ;;  %v3544_v10 = vcombine.low %v2772_v45, %v2775_v60  ;;  %v3536_v57 = vrot.slane %v2714_v37, 9  ;;  %v2780_v63 = vrot.slane %v2778_v35, 4  ;;  %v2781_v41 = vrot.slane %v4956_v39, 5 }
  0xbd   : > { %v3460_v54 = vcombine.low %v1625_v13, %v1635_v7  ;;  %v3537_v36 = vrot.slane %v2715_v24, 9  ;;  %v2787_v22 = vrot.slane %v2785_v11, 4  ;;  %v2788_v29 = vrot.slane %v4976_v55, 5 }
  0xbe   : > { %v1687_v6 = vrot.slane %v1685_v17, 4  ;;  %v1690_v2 = vrot.slane %v1688_v50, 5  ;;  %v1696_v27 = vrot.slane %v1694_v42, 5  ;;  %v1700_v5 = vrot.slane %v1698_v33, 4 }
  0xbf   : > { %v1668_v49 = vrot.slane %v1667_v46, 4  ;;  %v1678_v34 = vrot.slane %v1677_v3, 4  ;;  %v1682_v53 = vrot.slane %v1680_v44, 5  ;;  %v2779_v39 = vsel %vm4562_vm9, %v3536_v57, %v2778_v35 }
  0xc0   : > { %v2786_v55 = vsel %vm4562_vm9, %v3537_v36, %v2785_v11  ;;  %v2792_v38 = vrot.slane %v4965_v23, 5  ;;  %v2789_v59 = vsel %vm4562_vm9, %v2787_v22, %v2788_v29  ;;  %v1691_v61 = vor.u32 %v1690_v2, %v1687_v6 }
  0xc1   : > { %3894 = vmatmul.mubr.msk.bf16.vlgmr.msra.gmra.mrb[0].mxu0 %vm754_vm5, %v3541_v32  ;;  %v2782_v32 = vsel %vm4562_vm9, %v2780_v63, %v2781_v41  ;;  %v1701_v62 = vor.u32 %v1700_v5, %v1696_v27  ;;  %v1704_v19 = vshll.u32 %v5283_v8, 16  ;;  %v1673_v47 = vsel %vm4395_vm6, %v1668_v49, %v1672_v12 }
  0xc2   : > { %3897 = vmatprep.mubr.msk.bf16.mxu0 %vm754_vm5, %v3542_v15  ;;  %v2716_v15 = vld [vmem:[#allocation2 + $0x6c] sm:$0xe]  ;;  %v1683_v0 = vsel %vm4395_vm6, %v1678_v34, %v1682_v53  ;;  %v3545_v16 = vcombine.low %v2779_v39, %v2782_v32  ;;  %v2794_v23 = vrot.slane %v2792_v38, 4  ;;  %v2795_v58 = vrot.slane %v5004_v1, 5 }
  0xc3   : > { %3812 = vmatmul.mubr.msk.bf16.gmra.mrb[8].mxu1 %vm754_vm5, %v4106_v48  ;;  %v3546_v48 = vcombine.low %v2786_v55, %v2789_v59  ;;  %v3538_v30 = vrot.slane %v2716_v15, 9  ;;  %v3462_v25 = vcombine.low %v1673_v47, %v1683_v0  ;;  %v1692_v4 = vrot.slane %v1691_v61, 4 }
  0xc4   : > { %3815 = vmatprep.mubr.msk.bf16.mxu1 %vm754_vm5, %v4107_v9  ;;  %v1702_v9 = vrot.slane %v1701_v62, 4  ;;  %v1706_v43 = vrot.slane %v1704_v19, 5  ;;  %v2796_v12 = vsel %vm4562_vm9, %v2794_v23, %v2795_v58 }
  0xc5   : > { %v2793_v21 = vsel %vm4562_vm9, %v3538_v30, %v2792_v38  ;;  %v1697_v1 = vsel %vm4395_vm6, %v1692_v4, %v1696_v27 }
  0xc6   : > { %v1707_v31 = vsel %vm4395_vm6, %v1702_v9, %v1706_v43  ;;  %v3547_v18 = vcombine.low %v2793_v21, %v2796_v12 }
  0xc7   : > { %v3463_v26 = vcombine.low %v1697_v1, %v1707_v31 }
  0xc9   : > { %3898 = vmatmul.mubr.msk.bf16.gmra.mrb[4].mxu0 %vm754_vm5, %v3543_v14 }
  0xca   : > { %3901 = vmatprep.mubr.msk.bf16.mxu0 %vm754_vm5, %v3544_v10 }
  0xcb   : > { %3816 = vmatmul.mubr.msk.bf16.gmra.mrb[12].mxu1 %vm754_vm5, %v4108_v52 }
  0xcc   : > { %3829 = vmatprep.mubr.msk.bf16.mxu1 %vm754_vm5, %v3460_v54 }
  0xd1   : > { %3902 = vmatmul.mubr.msk.bf16.gmra.mrb[8].mxu0 %vm754_vm5, %v3545_v16 }
  0xd2   : > { %3905 = vmatprep.mubr.msk.bf16.mxu0 %vm754_vm5, %v3546_v48 }
  0xd3   : > { %3830 = vmatmul.mubr.msk.bf16.vlgmr.msra.gmra.mrb[8].mxu1 %vm754_vm5, %v5053_v40 }
  0xd4   : > { %3833 = vmatprep.mubr.msk.bf16.mxu1 %vm754_vm5, %v3462_v25 }
  0xd9   : > { %3906 = vmatmul.mubr.msk.bf16.gmra.mrb[12].mxu0 %vm754_vm5, %v3547_v18 }
  0xdb   : > { %3834 = vmatmul.mubr.msk.bf16.gmra.mrb[12].mxu1 %vm754_vm5, %v3463_v26 }
 0x186   : > { %v3805_v40 = vpop.f32.mrb[0].mxu1 }
 0x187   : > { %v1413_v51 = vpop.f32.mrb[1].mxu1 }
 0x188   : > { %v3806_v45 = vpop.f32.mrb[2].mxu1 }
 0x189   : > { %v1416_v35 = vpop.f32.mrb[3].mxu1 }
 0x18e   : > { %v3809_v28 = vpop.f32.mrb[4].mxu1 }
 0x18f   : > { %v1429_v13 = vpop.f32.mrb[5].mxu1 }
 0x190   : > { %v3810_v7 = vpop.f32.mrb[6].mxu1 }
 0x191   : > { %v1432_v60 = vpop.f32.mrb[7].mxu1 }
 0x194   : > { %v3895_v37 = vpop.f32.mrb[0].mxu0 }
 0x195   : > { %v3911_v11 = vadd.f32 %v3895_v37, %v3805_v40  ;;  %v2884_v24 = vpop.f32.mrb[1].mxu0 }
 0x196   : > { %v3912_v17 = vadd.f32 %v2884_v24, %v1413_v51  ;;  %v3896_v50 = vpop.f32.mrb[2].mxu0 }
 0x197   : > { %v5142_v42 = vadd.f32 %v3911_v11, %v5139_v56  ;;  %v3913_v33 = vadd.f32 %v3896_v50, %v3806_v45  ;;  %v2887_v14 = vpop.f32.mrb[3].mxu0 }
 0x198   : > { %v5145_v46 = vadd.f32 %v3912_v17, %v5139_v56  ;;  %v3914_v3 = vadd.f32 %v2887_v14, %v1416_v35 }
 0x199   : > { %v3559_v20 = vmul.f32 -1.442695, %v5142_v42  ;;  %v5149_v44 = vadd.f32 %v3913_v33, %v5139_v56 }
 0x19a   : > { %v3557_v10 = vmul.f32 -1.442695, %v5145_v46  ;;  %v5153_v57 = vadd.f32 %v3914_v3, %v5139_v56 }
 0x19b   : > { %4109 = vpow2.f32 %v3559_v20  ;;  %v3560_v63 = vmul.f32 -1.442695, %v5149_v44 }
 0x19c   : > { %4111 = vpow2.f32 %v3557_v10  ;;  %v3558_v41 = vmul.f32 -1.442695, %v5153_v57  ;;  %v3899_v52 = vpop.f32.mrb[4].mxu0 }
 0x19d   : > { %4113 = vpow2.f32 %v3560_v63  ;;  %v3915_v54 = vadd.f32 %v3899_v52, %v3809_v28  ;;  %v2900_v36 = vpop.f32.mrb[5].mxu0 }
 0x19e   : > { %4115 = vpow2.f32 %v3558_v41  ;;  %v3916_v22 = vadd.f32 %v2900_v36, %v1429_v13  ;;  %v3900_v29 = vpop.f32.mrb[6].mxu0 }
 0x19f   : > { %v5158_v6 = vadd.f32 %v3915_v54, %v5139_v56  ;;  %v3917_v2 = vadd.f32 %v3900_v29, %v3810_v7  ;;  %v2903_v27 = vpop.f32.mrb[7].mxu0 }
 0x1a0   : > { %v5161_v5 = vadd.f32 %v3916_v22, %v5139_v56  ;;  %v3918_v49 = vadd.f32 %v2903_v27, %v1432_v60 }
 0x1a1   : > { %v3563_v34 = vmul.f32 -1.442695, %v5158_v6  ;;  %v5165_v53 = vadd.f32 %v3917_v2, %v5139_v56 }
 0x1a2   : > { %v3561_v39 = vmul.f32 -1.442695, %v5161_v5  ;;  %v5169_v32 = vadd.f32 %v3918_v49, %v5139_v56 }
 0x1a3   : > { %4117 = vpow2.f32 %v3563_v34  ;;  %v3564_v55 = vmul.f32 -1.442695, %v5165_v53 }
 0x1a4   : > { %4119 = vpow2.f32 %v3561_v39  ;;  %v3562_v38 = vmul.f32 -1.442695, %v5169_v32  ;;  %v3903_v59 = vpop.f32.mrb[8].mxu0 }
 0x1a5   : > { %v4110_v61 = vpop.eup %4109  ;;  %4121 = vpow2.f32 %v3564_v55  ;;  %v2916_v8 = vpop.f32.mrb[9].mxu0 }
 0x1a6   : > { %v3831_v62 = vpop.f32.mrb[8].mxu1  ;;  %v4112_v19 = vpop.eup %4111  ;;  %v3036_v15 = vadd.f32 1.0, %v4110_v61  ;;  %4123 = vpow2.f32 %v3562_v38 }
 0x1a7   : > { %v3919_v47 = vadd.f32 %v3903_v59, %v3831_v62  ;;  %v1827_v0 = vpop.f32.mrb[9].mxu1  ;;  %v3904_v16 = vpop.f32.mrb[10].mxu0  ;;  %v3034_v30 = vadd.f32 1.0, %v4112_v19 }
 0x1a8   : > { %v4114_v48 = vpop.eup %4113  ;;  %v3920_v23 = vadd.f32 %v2916_v8, %v1827_v0  ;;  %v3832_v58 = vpop.f32.mrb[10].mxu1  ;;  %4125 = vrcp.f32 %v3036_v15 }
 0x1a9   : > { %v2919_v25 = vpop.f32.mrb[11].mxu0  ;;  %v4116_v4 = vpop.eup %4115  ;;  %v3037_v9 = vadd.f32 1.0, %v4114_v48  ;;  %v5175_v43 = vadd.f32 %v3919_v47, %v5139_v56  ;;  %v3921_v21 = vadd.f32 %v3904_v16, %v3832_v58  ;;  %4127 = vrcp.f32 %v3034_v30 }
 0x1aa   : > { %v1830_v12 = vpop.f32.mrb[11].mxu1  ;;  %v3035_v1 = vadd.f32 1.0, %v4116_v4  ;;  %v5183_v31 = vadd.f32 %v3920_v23, %v5139_v56 }
 0x1ab   : > { %v3922_v18 = vadd.f32 %v2919_v25, %v1830_v12  ;;  %4129 = vrcp.f32 %v3037_v9  ;;  %v3567_v26 = vmul.f32 -1.442695, %v5175_v43  ;;  %v5187_v40 = vadd.f32 %v3921_v21, %v5139_v56 }
 0x1ac   : > { %4131 = vrcp.f32 %v3035_v1  ;;  %v3565_v51 = vmul.f32 -1.442695, %v5183_v31  ;;  %v3907_v28 = vpop.f32.mrb[12].mxu0 }
 0x1ad   : > { %v5191_v45 = vadd.f32 %v3922_v18, %v5139_v56  ;;  %4133 = vpow2.f32 %v3567_v26  ;;  %v3568_v35 = vmul.f32 -1.442695, %v5187_v40  ;;  %v4118_v13 = vpop.eup %4117  ;;  %v2932_v37 = vpop.f32.mrb[13].mxu0 }
 0x1ae   : > { %4135 = vpow2.f32 %v3565_v51  ;;  %v3835_v60 = vpop.f32.mrb[12].mxu1  ;;  %v4120_v11 = vpop.eup %4119  ;;  %v3040_v24 = vadd.f32 1.0, %v4118_v13 }
 0x1af   : > { %v3566_v7 = vmul.f32 -1.442695, %v5191_v45  ;;  %4137 = vpow2.f32 %v3568_v35  ;;  %v3923_v17 = vadd.f32 %v3907_v28, %v3835_v60  ;;  %v1843_v50 = vpop.f32.mrb[13].mxu1  ;;  %v3908_v33 = vpop.f32.mrb[14].mxu0  ;;  %v3038_v3 = vadd.f32 1.0, %v4120_v11 }
 0x1b0   : > { %v4122_v14 = vpop.eup %4121  ;;  %v3924_v20 = vadd.f32 %v2932_v37, %v1843_v50  ;;  %v3836_v10 = vpop.f32.mrb[14].mxu1 }
 0x1b1   : > { %4139 = vpow2.f32 %v3566_v7  ;;  %v2935_v63 = vpop.f32.mrb[15].mxu0  ;;  %v4124_v41 = vpop.eup %4123  ;;  %v3041_v52 = vadd.f32 1.0, %v4122_v14  ;;  %v5200_v54 = vadd.f32 %v3923_v17, %v5139_v56  ;;  %v3925_v36 = vadd.f32 %v3908_v33, %v3836_v10 }
 0x1b2   : > { %4141 = vrcp.f32 %v3040_v24  ;;  %v1846_v22 = vpop.f32.mrb[15].mxu1  ;;  %v3039_v29 = vadd.f32 1.0, %v4124_v41  ;;  %v5203_v2 = vadd.f32 %v3924_v20, %v5139_v56  ;;  %v4126_v49 = vpop.eup %4125 }
 0x1b3   : > { %4143 = vrcp.f32 %v3038_v3  ;;  %v3926_v27 = vadd.f32 %v2935_v63, %v1846_v22  ;;  %v3571_v34 = vmul.f32 -1.442695, %v5200_v54  ;;  %v5207_v39 = vadd.f32 %v3925_v36, %v5139_v56  ;;  %v4128_v55 = vpop.eup %4127 }
 0x1b4   : > { %4145 = vrcp.f32 %v3041_v52  ;;  %v3569_v38 = vmul.f32 -1.442695, %v5203_v2  ;;  %v3084_v19 = vmul.f32 %v4126_v49, %v5142_v42  ;;  %v3082_v16 = vmul.f32 %v4128_v55, %v5145_v46 }
 0x1b5   : > { %4147 = vrcp.f32 %v3039_v29  ;;  %v5212_v59 = vadd.f32 %v3926_v27, %v5139_v56  ;;  %v4130_v61 = vpop.eup %4129  ;;  %v3572_v62 = vmul.f32 -1.442695, %v5207_v39 }
 0x1b6   : > { %4149 = vpow2.f32 %v3571_v34  ;;  %v4132_v8 = vpop.eup %4131  ;;  %v3085_v15 = vmul.f32 %v4130_v61, %v5149_v44 }
 0x1b7   : > { %4151 = vpow2.f32 %v3569_v38  ;;  %v3570_v47 = vmul.f32 -1.442695, %v5212_v59  ;;  %v4134_v0 = vpop.eup %4133  ;;  %v3083_v56 = vmul.f32 %v4132_v8, %v5153_v57 }
 0x1b8   : > { %4153 = vpow2.f32 %v3572_v62  ;;  %v4136_v48 = vpop.eup %4135  ;;  %v3627_v42 = vpack.c.bf16 %v3085_v15, %v3084_v19  ;;  %v3044_v30 = vadd.f32 1.0, %v4134_v0 }
 0x1b9   : > { %4155 = vpow2.f32 %v3570_v47  ;;  %v4138_v44 = vpop.eup %4137  ;;  %v3622_v23 = vpack.c.bf16 %v3083_v56, %v3082_v16  ;;  %v3042_v58 = vadd.f32 1.0, %v4136_v48 }
 0x1ba   : > { %3659 = vst [vmem:[%s5222_s10 + $0x8] sm:$0xff] %v3627_v42   ;;  %4157 = vrcp.f32 %v3044_v30  ;;  %v3045_v46 = vadd.f32 1.0, %v4138_v44 }
 0x1bb   : > { %v4140_v25 = vpop.eup %4139  ;;  %3623 = vst [vmem:[%s5222_s10] sm:$0xff] %v3622_v23   ;;  %4159 = vrcp.f32 %v3042_v58 }
 0x1bc   : > { %v4142_v4 = vpop.eup %4141  ;;  %v3043_v9 = vadd.f32 1.0, %v4140_v25  ;;  %4161 = vrcp.f32 %v3045_v46 }
 0x1bd   : > { %v4144_v21 = vpop.eup %4143  ;;  %v3088_v1 = vmul.f32 %v4142_v4, %v5158_v6 }
 0x1be   : > { %v4146_v57 = vpop.eup %4145  ;;  %4163 = vrcp.f32 %v3043_v9  ;;  %v3086_v51 = vmul.f32 %v4144_v21, %v5161_v5 }
 0x1bf   : > { %v4148_v12 = vpop.eup %4147  ;;  %v3089_v18 = vmul.f32 %v4146_v57, %v5165_v53 }
 0x1c0   : > { %v4150_v26 = vpop.eup %4149  ;;  %v3087_v35 = vmul.f32 %v4148_v12, %v5169_v32 }
 0x1c1   : > { %v4152_v28 = vpop.eup %4151  ;;  %v3637_v13 = vpack.c.bf16 %v3089_v18, %v3088_v1  ;;  %v3048_v7 = vadd.f32 1.0, %v4150_v26 }
 0x1c2   : > { %v4154_v60 = vpop.eup %4153  ;;  %v3632_v37 = vpack.c.bf16 %v3087_v35, %v3086_v51  ;;  %v3046_v11 = vadd.f32 1.0, %v4152_v28 }
 0x1c3   : > { %v4156_v24 = vpop.eup %4155  ;;  %3661 = vst [vmem:[%s5222_s10 + $0x18] sm:$0xff] %v3637_v13   ;;  %4165 = vrcp.f32 %v3048_v7  ;;  %v3049_v17 = vadd.f32 1.0, %v4154_v60 }
 0x1c4   : > { %3660 = vst [vmem:[%s5222_s10 + $0x10] sm:$0xff] %v3632_v37   ;;  %4167 = vrcp.f32 %v3046_v11  ;;  %v3047_v6 = vadd.f32 1.0, %v4156_v24  ;;  %v4158_v53 = vpop.eup %4157 }
 0x1c5   : > { %4169 = vrcp.f32 %v3049_v17  ;;  %v4160_v5 = vpop.eup %4159  ;;  %v3092_v33 = vmul.f32 %v4158_v53, %v5175_v43 }
 0x1c6   : > { %4171 = vrcp.f32 %v3047_v6  ;;  %v4162_v32 = vpop.eup %4161  ;;  %v3090_v3 = vmul.f32 %v4160_v5, %v5183_v31 }
 0x1c7   : > { %v3093_v14 = vmul.f32 %v4162_v32, %v5187_v40 }
 0x1c8   : > { %v4164_v50 = vpop.eup %4163 }
 0x1c9   : > { %v3091_v20 = vmul.f32 %v4164_v50, %v5191_v45  ;;  %v3647_v10 = vpack.c.bf16 %v3093_v14, %v3092_v33 }
 0x1cb   : > { %v3642_v63 = vpack.c.bf16 %v3091_v20, %v3090_v3  ;;  %3663 = vst [vmem:[%s5222_s10 + $0x28] sm:$0xff] %v3647_v10  }
 0x1cd   : > { %v4166_v41 = vpop.eup %4165  ;;  %3662 = vst [vmem:[%s5222_s10 + $0x20] sm:$0xff] %v3642_v63  }
 0x1ce   : > { %v4168_v52 = vpop.eup %4167  ;;  %v3096_v29 = vmul.f32 %v4166_v41, %v5200_v54 }
 0x1cf   : > { %v4170_v36 = vpop.eup %4169  ;;  %v3094_v40 = vmul.f32 %v4168_v52, %v5203_v2 }
 0x1d0   : > { %v4172_v22 = vpop.eup %4171  ;;  %v3097_v43 = vmul.f32 %v4170_v36, %v5207_v39 }
 0x1d1   : > { %v3095_v31 = vmul.f32 %v4172_v22, %v5212_v59 }
 0x1d2   : > { %v3657_v27 = vpack.c.bf16 %v3097_v43, %v3096_v29 }
 0x1d3   : > { %v3652_v49 = vpack.c.bf16 %v3095_v31, %v3094_v40 }
 0x1d4   : > { %3665 = vst [vmem:[%s5222_s10 + $0x38] sm:$0xff] %v3657_v27  }
 0x1d5   : > { %3664 = vst [vmem:[%s5222_s10 + $0x30] sm:$0xff] %v3652_v49  }
 0x1d6 PF: > { %s15_s22 = sadd.s32 1, %s4212_s22   ;;  %s5284_s18 = smov %s4204_s20 }
 0x1d7   : > { %p12_p10 = scmp.ge.s32.totalorder %s15_s22, 6   ;;  %s5285_s19 = smov %s4208_s21 }
 0x1d8   : > { %s5286_s20 = smov %s5289_s23  ;;  %s5287_s21 = smov %s5293_s24 }
 0x1d9   :  { %14 = sbr.rel (!%p12_p10) target bundleno = 3 (0x3), region = 94 }

</bundles_post_ra>
